<compile_context>
chip_gen: v7x
topology: tpu7x:2x2x1
jax: 0.10.0
libtpu: 0.0.40
codegen_flags: <defaults>
</compile_context>

<pallas_src>
import functools
import math

import jax
import jax.numpy as jnp
import numpy as np
from jax import lax
from jax.experimental import pallas as pl
from jax.experimental.pallas import tpu as pltpu


def _round_up(v, m=8):
    return ((v + m - 1) // m) * m


def _tap_geometry(H, W):
    """Static per-tap (lane-roll shift, needs_mask) for a 3x3 SAME conv.

    tap_t(v)[c, p] = v[c, p + k_t] with a zero halo, where k_t = dy*W + dx.
    A left rotation by k_t equals jnp.roll/pltpu.roll with shift = (-k_t) % S.
    """
    S = H * W
    shifts, needs_mask = [], []
    for ky in range(3):
        for kx in range(3):
            dy, dx = ky - 1, kx - 1
            k = dy * W + dx
            shifts.append((-k) % S)
            needs_mask.append(not (dy == 0 and dx == 0))
    return tuple(shifts), tuple(needs_mask)


def _border_masks(H, W):
    """(9, H*W) float32 validity masks for the 3x3 SAME-padding halo."""
    y, x = np.meshgrid(np.arange(H), np.arange(W), indexing="ij")
    y = y.reshape(-1)
    x = x.reshape(-1)
    rows = []
    for ky in range(3):
        for kx in range(3):
            dy, dx = ky - 1, kx - 1
            valid = ((y + dy >= 0) & (y + dy < H) &
                     (x + dx >= 0) & (x + dx < W))
            rows.append(valid.astype(np.float32))
    return jnp.asarray(np.stack(rows, axis=0))


def _fpn_head_kernel(x_ref, mask_ref, w0_ref, d0_ref, w1_ref, d1_ref, o_ref,
                     *, H, W):
    # x_ref  : (Cin_p, S)              image channels on sublanes, S=H*W on lanes
    # mask_ref: (9, S)                 0/1 border-validity masks per 3x3 tap
    # w*_ref : (9, init_p, cin_rows)   per-tap dense primary-conv matrices
    # d*_ref : (new_p, 9)              per-channel depthwise tap weights
    # o_ref  : (out_rows, S)           lane-dense, full-sublane output block
    S = H * W
    shifts, needs_mask = _tap_geometry(H, W)
    masks = mask_ref[...]                               # (9, S)
    x = x_ref[...].astype(jnp.float32)                  # (Cin_p, S)

    def tap(v, t):
        # 3x3 tap t of v with SAME zero padding: one XLU lane rotate + mask.
        r = v if shifts[t] == 0 else pltpu.roll(v, shifts[t], 1)
        if needs_mask[t]:
            r = r * masks[t:t + 1, :]
        return r

    def conv3x3(v, w_ref):
        # Dense 3x3 conv as 9 accumulated MXU matmuls: sum_t W_t @ tap_t(v).
        # Start with the (unmasked, unrolled) center tap.
        acc = jnp.dot(w_ref[4], v.astype(jnp.float32),
                      preferred_element_type=jnp.float32)
        for t in range(9):
            if t == 4:
                continue
            acc = acc + jnp.dot(w_ref[t], tap(v, t),
                                preferred_element_type=jnp.float32)
        return acc                                      # (init_p, S) f32

    def dwconv3x3(v, d_ref):
        # Depthwise 3x3 conv on the VPU: 9 per-channel FMAs over rolled slices.
        d = d_ref[...].astype(jnp.float32)              # (new_p, 9)
        acc = d[:, 4:5] * v
        for t in range(9):
            if t == 4:
                continue
            acc = acc + d[:, t:t + 1] * tap(v, t)
        return acc                                      # (new_p, S) f32

    def ghost(v, w_ref, d_ref):
        x1 = conv3x3(v, w_ref)                          # (init_p, S)
        new_p = d_ref.shape[0]
        x2 = dwconv3x3(x1[:new_p], d_ref)               # aligned sublane slice
        return jnp.concatenate([x1, x2], axis=0)        # vreg-aligned concat

    a0 = jnp.maximum(ghost(x, w0_ref, d0_ref), 0.0)     # relu(block0), padded
    a1 = jnp.maximum(ghost(a0, w1_ref, d1_ref), 0.0)    # relu(block1), padded
    o_ref[...] = a1.astype(o_ref.dtype)


def _primary_tap_weights(wp, cin_dest, cin_rows, cout_rows):
    """(3,3,Cin,Cout) HWIO -> (9, cout_rows, cin_rows) per-tap dense matrices.

    cin_dest maps each original input channel to its (padded) sublane row in
    the kernel's intermediate layout; padded rows/cols stay zero.
    """
    kh, kw, cin, cout = wp.shape
    w = jnp.transpose(wp, (0, 1, 3, 2)).reshape(kh * kw, cout, cin)
    out = jnp.zeros((kh * kw, cout_rows, cin_rows), jnp.float32)
    return out.at[:, :cout, jnp.asarray(cin_dest)].set(w.astype(jnp.float32))


def _cheap_tap_weights(wd, n_keep, rows):
    """Depthwise (3,3,C) weights -> (rows, 9) per-channel tap weights.

    Only the first n_keep ghost channels (those surviving the [:oup] slice)
    get nonzero weights; padded rows stay zero so padded channels are zero.
    """
    kh, kw, c = wd.shape
    w = jnp.transpose(wd, (2, 0, 1)).reshape(c, kh * kw)
    out = jnp.zeros((rows, kh * kw), jnp.float32)
    return out.at[:n_keep].set(w[:n_keep].astype(jnp.float32))


def fpn_head_forward(x_nchw, params, num_mid, num_out):
    """FPNHead forward. x_nchw: (N, Cin, H, W) float32 -> (N, num_out, H, W)."""
    w0p, w0d, w1p, w1d = params
    N, Cin, H, W = x_nchw.shape
    S = H * W
    c0i = w0p.shape[-1]
    c1i = w1p.shape[-1]
    new0 = num_mid - c0i
    new1 = num_out - c1i
    # GhostModule invariants (ratio=2, init=ceil(oup/2)): the [:oup] slice
    # keeps all init channels plus the first (oup - init) ghost channels.
    assert 0 < new0 <= c0i and 0 < new1 <= c1i
    assert w1p.shape[2] == num_mid and w0d.shape[-1] == c0i and w1d.shape[-1] == c1i

    cin_p = _round_up(Cin)
    c0i_p, new0_p = _round_up(c0i), _round_up(new0)
    c1i_p, new1_p = _round_up(c1i), _round_up(new1)
    mid_rows = c0i_p + new0_p
    out_rows = c1i_p + new1_p

    # NCHW -> (N, C, H*W): pure reshape (no transpose); channel pad only if
    # Cin is not already a sublane multiple (no-op for the common case).
    x3 = x_nchw.reshape(N, Cin, S)
    if cin_p != Cin:
        x3 = jnp.pad(x3, ((0, 0), (0, cin_p - Cin), (0, 0)))

    masks = _border_masks(H, W)
    # Block0 primary conv: inputs are the (padded) image channels.
    w0 = _primary_tap_weights(w0p, list(range(Cin)), cin_p, c0i_p)
    d0 = _cheap_tap_weights(w0d, new0, new0_p)
    # Block1 primary conv: PyTorch input channel j lives at padded row j
    # (primary channel, j < c0i) or at c0i_p + (j - c0i) (kept ghost channel).
    dest1 = [j if j < c0i else c0i_p + (j - c0i) for j in range(num_mid)]
    w1 = _primary_tap_weights(w1p, dest1, mid_rows, c1i_p)
    d1 = _cheap_tap_weights(w1d, new1, new1_p)

    kernel = functools.partial(_fpn_head_kernel, H=H, W=W)

    flops = 2 * 9 * S * N * (cin_p * c0i_p + new0_p + mid_rows * c1i_p + new1_p)
    bytes_accessed = 4 * (x3.size + masks.size + w0.size + d0.size + w1.size
                          + d1.size + N * out_rows * S)

    out_p = pl.pallas_call(
        kernel,
        out_shape=jax.ShapeDtypeStruct((N, out_rows, S), x_nchw.dtype),
        grid=(N,),
        in_specs=[
            pl.BlockSpec((None, cin_p, S), lambda n: (n, 0, 0)),
            pl.BlockSpec((9, S), lambda n: (0, 0)),
            pl.BlockSpec(w0.shape, lambda n: (0, 0, 0)),
            pl.BlockSpec(d0.shape, lambda n: (0, 0)),
            pl.BlockSpec(w1.shape, lambda n: (0, 0, 0)),
            pl.BlockSpec(d1.shape, lambda n: (0, 0)),
        ],
        out_specs=pl.BlockSpec((None, out_rows, S), lambda n: (n, 0, 0)),
        compiler_params=pltpu.CompilerParams(
            dimension_semantics=("parallel",)),
        cost_estimate=pl.CostEstimate(
            flops=flops, transcendentals=0, bytes_accessed=bytes_accessed),
    )(x3, masks, w0, d0, w1, d1)

    # Strip padded rows: [0, c1i) are the primary channels, [c1i_p, c1i_p+new1)
    # the kept ghost channels (matches torch.cat([x1, x2])[:, :oup]).
    out = jnp.concatenate([out_p[:, :c1i], out_p[:, c1i_p:c1i_p + new1]], axis=1)
    return out.reshape(N, num_out, H, W)


def fpn_head_reference(x_nchw, params, num_mid, num_out):
    """Pure-JAX reference (lax.conv) mirroring the PyTorch module semantics."""
    w0p, w0d, w1p, w1d = params
    x = jnp.transpose(x_nchw, (0, 2, 3, 1)).astype(jnp.float32)

    def ghost(x, wp, wd, oup):
        x1 = lax.conv_general_dilated(
            x, wp, (1, 1), 'SAME',
            dimension_numbers=('NHWC', 'HWIO', 'NHWC'))
        c = x1.shape[-1]
        x2 = lax.conv_general_dilated(
            x1, wd[:, :, None, :], (1, 1), 'SAME',
            dimension_numbers=('NHWC', 'HWIO', 'NHWC'),
            feature_group_count=c)
        return jnp.concatenate([x1, x2], axis=-1)[..., :oup]

    a = jax.nn.relu(ghost(x, w0p, w0d, num_mid))
    a = jax.nn.relu(ghost(a, w1p, w1d, num_out))
    return jnp.transpose(a, (0, 3, 1, 2))


if __name__ == "__main__":
    # Small FPNHead: num_in=8, num_mid=5, num_out=4, N=2, H=W=16.
    N, num_in, H, W = 2, 8, 16, 16
    num_mid, num_out = 5, 4
    c0i = math.ceil(num_mid / 2)   # GhostModule init channels of block0
    c1i = math.ceil(num_out / 2)   # GhostModule init channels of block1

    key = jax.random.PRNGKey(0)
    k0, k1, k2, k3, kx = jax.random.split(key, 5)
    # Deterministic synthetic weights (HWIO for dense convs, HWC for depthwise).
    w0p = 0.1 * jax.random.normal(k0, (3, 3, num_in, c0i), jnp.float32)
    w0d = 0.1 * jax.random.normal(k1, (3, 3, c0i), jnp.float32)
    w1p = 0.1 * jax.random.normal(k2, (3, 3, num_mid, c1i), jnp.float32)
    w1d = 0.1 * jax.random.normal(k3, (3, 3, c1i), jnp.float32)
    params = (w0p, w0d, w1p, w1d)

    x = jax.random.normal(kx, (N, num_in, H, W), jnp.float32)

    out = jax.block_until_ready(fpn_head_forward(x, params, num_mid, num_out))
    ref = jax.block_until_ready(fpn_head_reference(x, params, num_mid, num_out))
    np.testing.assert_allclose(np.asarray(out), np.asarray(ref),
                               rtol=1e-5, atol=1e-5)
    assert out.shape == (N, num_out, H, W)
    print("KERNEL_OK")
</pallas_src>

<mosaic_0001>
module attributes {stable_mosaic.version = 11 : i64} {
  func.func @_fpn_head_kernel(%arg0: i32, %arg1: memref<1x8x256xf32, #tpu.memory_space<vmem>>, %arg2: memref<9x256xf32, #tpu.memory_space<vmem>>, %arg3: memref<9x8x8xf32, #tpu.memory_space<vmem>>, %arg4: memref<8x9xf32, #tpu.memory_space<vmem>>, %arg5: memref<9x8x16xf32, #tpu.memory_space<vmem>>, %arg6: memref<8x9xf32, #tpu.memory_space<vmem>>, %arg7: memref<1x16x256xf32, #tpu.memory_space<vmem>>) attributes {dimension_semantics = [#tpu.dimension_semantics<parallel>], iteration_bounds = array<i64: 2>, scalar_prefetch = 0 : i64, scratch_operands = 0 : i64, tpu.core_type = #tpu.core_type<tc>, window_params = [{transform_indices = @transform_0, window_bounds = array<i64: 1, 8, 256>}, {pipeline_mode = #tpu.pipeline_mode<synchronous>, transform_indices = @transform_1, window_bounds = array<i64: 9, 256>}, {pipeline_mode = #tpu.pipeline_mode<synchronous>, transform_indices = @transform_2, window_bounds = array<i64: 9, 8, 8>}, {pipeline_mode = #tpu.pipeline_mode<synchronous>, transform_indices = @transform_3, window_bounds = array<i64: 8, 9>}, {pipeline_mode = #tpu.pipeline_mode<synchronous>, transform_indices = @transform_4, window_bounds = array<i64: 9, 8, 16>}, {pipeline_mode = #tpu.pipeline_mode<synchronous>, transform_indices = @transform_5, window_bounds = array<i64: 8, 9>}, {transform_indices = @transform_6, window_bounds = array<i64: 1, 16, 256>}]} {
    %c0 = arith.constant 0 : index
    %c0_0 = arith.constant 0 : index
    %0 = vector.load %arg2[%c0, %c0_0] : memref<9x256xf32, #tpu.memory_space<vmem>>, vector<9x256xf32>
    %c0_1 = arith.constant 0 : index
    %c0_2 = arith.constant 0 : index
    %c0_3 = arith.constant 0 : index
    %1 = vector.load %arg1[%c0_1, %c0_2, %c0_3] : memref<1x8x256xf32, #tpu.memory_space<vmem>>, vector<1x8x256xf32>
    %2 = vector.shape_cast %1 : vector<1x8x256xf32> to vector<8x256xf32>
    %c4 = arith.constant 4 : index
    %c0_4 = arith.constant 0 : index
    %c0_5 = arith.constant 0 : index
    %3 = vector.load %arg3[%c4, %c0_4, %c0_5] : memref<9x8x8xf32, #tpu.memory_space<vmem>>, vector<1x8x8xf32>
    %4 = vector.shape_cast %3 : vector<1x8x8xf32> to vector<8x8xf32>
    %cst = arith.constant dense<0.000000e+00> : vector<8x256xf32>
    %5 = tpu.matmul %4, %2, %cst {dimension_numbers = #tpu.dot_dimension_numbers<[1], [0], [0], [1], [0, 0, 1, 1], [], []>} : vector<8x8xf32>, vector<8x256xf32>, vector<8x256xf32> -> vector<8x256xf32>
    %c0_6 = arith.constant 0 : index
    %c0_7 = arith.constant 0 : index
    %c0_8 = arith.constant 0 : index
    %6 = vector.load %arg3[%c0_6, %c0_7, %c0_8] : memref<9x8x8xf32, #tpu.memory_space<vmem>>, vector<1x8x8xf32>
    %7 = vector.shape_cast %6 : vector<1x8x8xf32> to vector<8x8xf32>
    %c17_i32 = arith.constant 17 : i32
    %8 = tpu.dynamic_rotate %2 by %c17_i32 dim 1 : vector<8x256xf32>, i32 -> vector<8x256xf32>
    %9 = vector.extract_strided_slice %0 {offsets = [0, 0], sizes = [1, 256], strides = [1, 1]} : vector<9x256xf32> to vector<1x256xf32>
    %10 = vector.broadcast %9 : vector<1x256xf32> to vector<8x256xf32>
    %11 = arith.mulf %8, %10 : vector<8x256xf32>
    %cst_9 = arith.constant dense<0.000000e+00> : vector<8x256xf32>
    %12 = tpu.matmul %7, %11, %cst_9 {dimension_numbers = #tpu.dot_dimension_numbers<[1], [0], [0], [1], [0, 0, 1, 1], [], []>} : vector<8x8xf32>, vector<8x256xf32>, vector<8x256xf32> -> vector<8x256xf32>
    %13 = arith.addf %5, %12 : vector<8x256xf32>
    %c1 = arith.constant 1 : index
    %c0_10 = arith.constant 0 : index
    %c0_11 = arith.constant 0 : index
    %14 = vector.load %arg3[%c1, %c0_10, %c0_11] : memref<9x8x8xf32, #tpu.memory_space<vmem>>, vector<1x8x8xf32>
    %15 = vector.shape_cast %14 : vector<1x8x8xf32> to vector<8x8xf32>
    %c16_i32 = arith.constant 16 : i32
    %16 = tpu.dynamic_rotate %2 by %c16_i32 dim 1 : vector<8x256xf32>, i32 -> vector<8x256xf32>
    %17 = vector.extract_strided_slice %0 {offsets = [1, 0], sizes = [1, 256], strides = [1, 1]} : vector<9x256xf32> to vector<1x256xf32>
    %18 = vector.broadcast %17 : vector<1x256xf32> to vector<8x256xf32>
    %19 = arith.mulf %16, %18 : vector<8x256xf32>
    %cst_12 = arith.constant dense<0.000000e+00> : vector<8x256xf32>
    %20 = tpu.matmul %15, %19, %cst_12 {dimension_numbers = #tpu.dot_dimension_numbers<[1], [0], [0], [1], [0, 0, 1, 1], [], []>} : vector<8x8xf32>, vector<8x256xf32>, vector<8x256xf32> -> vector<8x256xf32>
    %21 = arith.addf %13, %20 : vector<8x256xf32>
    %c2 = arith.constant 2 : index
    %c0_13 = arith.constant 0 : index
    %c0_14 = arith.constant 0 : index
    %22 = vector.load %arg3[%c2, %c0_13, %c0_14] : memref<9x8x8xf32, #tpu.memory_space<vmem>>, vector<1x8x8xf32>
    %23 = vector.shape_cast %22 : vector<1x8x8xf32> to vector<8x8xf32>
    %c15_i32 = arith.constant 15 : i32
    %24 = tpu.dynamic_rotate %2 by %c15_i32 dim 1 : vector<8x256xf32>, i32 -> vector<8x256xf32>
    %25 = vector.extract_strided_slice %0 {offsets = [2, 0], sizes = [1, 256], strides = [1, 1]} : vector<9x256xf32> to vector<1x256xf32>
    %26 = vector.broadcast %25 : vector<1x256xf32> to vector<8x256xf32>
    %27 = arith.mulf %24, %26 : vector<8x256xf32>
    %cst_15 = arith.constant dense<0.000000e+00> : vector<8x256xf32>
    %28 = tpu.matmul %23, %27, %cst_15 {dimension_numbers = #tpu.dot_dimension_numbers<[1], [0], [0], [1], [0, 0, 1, 1], [], []>} : vector<8x8xf32>, vector<8x256xf32>, vector<8x256xf32> -> vector<8x256xf32>
    %29 = arith.addf %21, %28 : vector<8x256xf32>
    %c3 = arith.constant 3 : index
    %c0_16 = arith.constant 0 : index
    %c0_17 = arith.constant 0 : index
    %30 = vector.load %arg3[%c3, %c0_16, %c0_17] : memref<9x8x8xf32, #tpu.memory_space<vmem>>, vector<1x8x8xf32>
    %31 = vector.shape_cast %30 : vector<1x8x8xf32> to vector<8x8xf32>
    %c1_i32 = arith.constant 1 : i32
    %32 = tpu.dynamic_rotate %2 by %c1_i32 dim 1 : vector<8x256xf32>, i32 -> vector<8x256xf32>
    %33 = vector.extract_strided_slice %0 {offsets = [3, 0], sizes = [1, 256], strides = [1, 1]} : vector<9x256xf32> to vector<1x256xf32>
    %34 = vector.broadcast %33 : vector<1x256xf32> to vector<8x256xf32>
    %35 = arith.mulf %32, %34 : vector<8x256xf32>
    %cst_18 = arith.constant dense<0.000000e+00> : vector<8x256xf32>
    %36 = tpu.matmul %31, %35, %cst_18 {dimension_numbers = #tpu.dot_dimension_numbers<[1], [0], [0], [1], [0, 0, 1, 1], [], []>} : vector<8x8xf32>, vector<8x256xf32>, vector<8x256xf32> -> vector<8x256xf32>
    %37 = arith.addf %29, %36 : vector<8x256xf32>
    %c5 = arith.constant 5 : index
    %c0_19 = arith.constant 0 : index
    %c0_20 = arith.constant 0 : index
    %38 = vector.load %arg3[%c5, %c0_19, %c0_20] : memref<9x8x8xf32, #tpu.memory_space<vmem>>, vector<1x8x8xf32>
    %39 = vector.shape_cast %38 : vector<1x8x8xf32> to vector<8x8xf32>
    %c255_i32 = arith.constant 255 : i32
    %40 = tpu.dynamic_rotate %2 by %c255_i32 dim 1 : vector<8x256xf32>, i32 -> vector<8x256xf32>
    %41 = vector.extract_strided_slice %0 {offsets = [5, 0], sizes = [1, 256], strides = [1, 1]} : vector<9x256xf32> to vector<1x256xf32>
    %42 = vector.broadcast %41 : vector<1x256xf32> to vector<8x256xf32>
    %43 = arith.mulf %40, %42 : vector<8x256xf32>
    %cst_21 = arith.constant dense<0.000000e+00> : vector<8x256xf32>
    %44 = tpu.matmul %39, %43, %cst_21 {dimension_numbers = #tpu.dot_dimension_numbers<[1], [0], [0], [1], [0, 0, 1, 1], [], []>} : vector<8x8xf32>, vector<8x256xf32>, vector<8x256xf32> -> vector<8x256xf32>
    %45 = arith.addf %37, %44 : vector<8x256xf32>
    %c6 = arith.constant 6 : index
    %c0_22 = arith.constant 0 : index
    %c0_23 = arith.constant 0 : index
    %46 = vector.load %arg3[%c6, %c0_22, %c0_23] : memref<9x8x8xf32, #tpu.memory_space<vmem>>, vector<1x8x8xf32>
    %47 = vector.shape_cast %46 : vector<1x8x8xf32> to vector<8x8xf32>
    %c241_i32 = arith.constant 241 : i32
    %48 = tpu.dynamic_rotate %2 by %c241_i32 dim 1 : vector<8x256xf32>, i32 -> vector<8x256xf32>
    %49 = vector.extract_strided_slice %0 {offsets = [6, 0], sizes = [1, 256], strides = [1, 1]} : vector<9x256xf32> to vector<1x256xf32>
    %50 = vector.broadcast %49 : vector<1x256xf32> to vector<8x256xf32>
    %51 = arith.mulf %48, %50 : vector<8x256xf32>
    %cst_24 = arith.constant dense<0.000000e+00> : vector<8x256xf32>
    %52 = tpu.matmul %47, %51, %cst_24 {dimension_numbers = #tpu.dot_dimension_numbers<[1], [0], [0], [1], [0, 0, 1, 1], [], []>} : vector<8x8xf32>, vector<8x256xf32>, vector<8x256xf32> -> vector<8x256xf32>
    %53 = arith.addf %45, %52 : vector<8x256xf32>
    %c7 = arith.constant 7 : index
    %c0_25 = arith.constant 0 : index
    %c0_26 = arith.constant 0 : index
    %54 = vector.load %arg3[%c7, %c0_25, %c0_26] : memref<9x8x8xf32, #tpu.memory_space<vmem>>, vector<1x8x8xf32>
    %55 = vector.shape_cast %54 : vector<1x8x8xf32> to vector<8x8xf32>
    %c240_i32 = arith.constant 240 : i32
    %56 = tpu.dynamic_rotate %2 by %c240_i32 dim 1 : vector<8x256xf32>, i32 -> vector<8x256xf32>
    %57 = vector.extract_strided_slice %0 {offsets = [7, 0], sizes = [1, 256], strides = [1, 1]} : vector<9x256xf32> to vector<1x256xf32>
    %58 = vector.broadcast %57 : vector<1x256xf32> to vector<8x256xf32>
    %59 = arith.mulf %56, %58 : vector<8x256xf32>
    %cst_27 = arith.constant dense<0.000000e+00> : vector<8x256xf32>
    %60 = tpu.matmul %55, %59, %cst_27 {dimension_numbers = #tpu.dot_dimension_numbers<[1], [0], [0], [1], [0, 0, 1, 1], [], []>} : vector<8x8xf32>, vector<8x256xf32>, vector<8x256xf32> -> vector<8x256xf32>
    %61 = arith.addf %53, %60 : vector<8x256xf32>
    %c8 = arith.constant 8 : index
    %c0_28 = arith.constant 0 : index
    %c0_29 = arith.constant 0 : index
    %62 = vector.load %arg3[%c8, %c0_28, %c0_29] : memref<9x8x8xf32, #tpu.memory_space<vmem>>, vector<1x8x8xf32>
    %63 = vector.shape_cast %62 : vector<1x8x8xf32> to vector<8x8xf32>
    %c239_i32 = arith.constant 239 : i32
    %64 = tpu.dynamic_rotate %2 by %c239_i32 dim 1 : vector<8x256xf32>, i32 -> vector<8x256xf32>
    %65 = vector.extract_strided_slice %0 {offsets = [8, 0], sizes = [1, 256], strides = [1, 1]} : vector<9x256xf32> to vector<1x256xf32>
    %66 = vector.broadcast %65 : vector<1x256xf32> to vector<8x256xf32>
    %67 = arith.mulf %64, %66 : vector<8x256xf32>
    %cst_30 = arith.constant dense<0.000000e+00> : vector<8x256xf32>
    %68 = tpu.matmul %63, %67, %cst_30 {dimension_numbers = #tpu.dot_dimension_numbers<[1], [0], [0], [1], [0, 0, 1, 1], [], []>} : vector<8x8xf32>, vector<8x256xf32>, vector<8x256xf32> -> vector<8x256xf32>
    %69 = arith.addf %61, %68 : vector<8x256xf32>
    %c0_31 = arith.constant 0 : index
    %c0_32 = arith.constant 0 : index
    %70 = vector.load %arg4[%c0_31, %c0_32] : memref<8x9xf32, #tpu.memory_space<vmem>>, vector<8x9xf32>
    %71 = vector.extract_strided_slice %70 {offsets = [0, 4], sizes = [8, 1], strides = [1, 1]} : vector<8x9xf32> to vector<8x1xf32>
    %72 = vector.broadcast %71 : vector<8x1xf32> to vector<8x256xf32>
    %73 = arith.mulf %72, %69 : vector<8x256xf32>
    %74 = vector.extract_strided_slice %70 {offsets = [0, 0], sizes = [8, 1], strides = [1, 1]} : vector<8x9xf32> to vector<8x1xf32>
    %c17_i32_33 = arith.constant 17 : i32
    %75 = tpu.dynamic_rotate %69 by %c17_i32_33 dim 1 : vector<8x256xf32>, i32 -> vector<8x256xf32>
    %76 = vector.extract_strided_slice %0 {offsets = [0, 0], sizes = [1, 256], strides = [1, 1]} : vector<9x256xf32> to vector<1x256xf32>
    %77 = vector.broadcast %76 : vector<1x256xf32> to vector<8x256xf32>
    %78 = arith.mulf %75, %77 : vector<8x256xf32>
    %79 = vector.broadcast %74 : vector<8x1xf32> to vector<8x256xf32>
    %80 = arith.mulf %79, %78 : vector<8x256xf32>
    %81 = arith.addf %73, %80 : vector<8x256xf32>
    %82 = vector.extract_strided_slice %70 {offsets = [0, 1], sizes = [8, 1], strides = [1, 1]} : vector<8x9xf32> to vector<8x1xf32>
    %c16_i32_34 = arith.constant 16 : i32
    %83 = tpu.dynamic_rotate %69 by %c16_i32_34 dim 1 : vector<8x256xf32>, i32 -> vector<8x256xf32>
    %84 = vector.extract_strided_slice %0 {offsets = [1, 0], sizes = [1, 256], strides = [1, 1]} : vector<9x256xf32> to vector<1x256xf32>
    %85 = vector.broadcast %84 : vector<1x256xf32> to vector<8x256xf32>
    %86 = arith.mulf %83, %85 : vector<8x256xf32>
    %87 = vector.broadcast %82 : vector<8x1xf32> to vector<8x256xf32>
    %88 = arith.mulf %87, %86 : vector<8x256xf32>
    %89 = arith.addf %81, %88 : vector<8x256xf32>
    %90 = vector.extract_strided_slice %70 {offsets = [0, 2], sizes = [8, 1], strides = [1, 1]} : vector<8x9xf32> to vector<8x1xf32>
    %c15_i32_35 = arith.constant 15 : i32
    %91 = tpu.dynamic_rotate %69 by %c15_i32_35 dim 1 : vector<8x256xf32>, i32 -> vector<8x256xf32>
    %92 = vector.extract_strided_slice %0 {offsets = [2, 0], sizes = [1, 256], strides = [1, 1]} : vector<9x256xf32> to vector<1x256xf32>
    %93 = vector.broadcast %92 : vector<1x256xf32> to vector<8x256xf32>
    %94 = arith.mulf %91, %93 : vector<8x256xf32>
    %95 = vector.broadcast %90 : vector<8x1xf32> to vector<8x256xf32>
    %96 = arith.mulf %95, %94 : vector<8x256xf32>
    %97 = arith.addf %89, %96 : vector<8x256xf32>
    %98 = vector.extract_strided_slice %70 {offsets = [0, 3], sizes = [8, 1], strides = [1, 1]} : vector<8x9xf32> to vector<8x1xf32>
    %c1_i32_36 = arith.constant 1 : i32
    %99 = tpu.dynamic_rotate %69 by %c1_i32_36 dim 1 : vector<8x256xf32>, i32 -> vector<8x256xf32>
    %100 = vector.extract_strided_slice %0 {offsets = [3, 0], sizes = [1, 256], strides = [1, 1]} : vector<9x256xf32> to vector<1x256xf32>
    %101 = vector.broadcast %100 : vector<1x256xf32> to vector<8x256xf32>
    %102 = arith.mulf %99, %101 : vector<8x256xf32>
    %103 = vector.broadcast %98 : vector<8x1xf32> to vector<8x256xf32>
    %104 = arith.mulf %103, %102 : vector<8x256xf32>
    %105 = arith.addf %97, %104 : vector<8x256xf32>
    %106 = vector.extract_strided_slice %70 {offsets = [0, 5], sizes = [8, 1], strides = [1, 1]} : vector<8x9xf32> to vector<8x1xf32>
    %c255_i32_37 = arith.constant 255 : i32
    %107 = tpu.dynamic_rotate %69 by %c255_i32_37 dim 1 : vector<8x256xf32>, i32 -> vector<8x256xf32>
    %108 = vector.extract_strided_slice %0 {offsets = [5, 0], sizes = [1, 256], strides = [1, 1]} : vector<9x256xf32> to vector<1x256xf32>
    %109 = vector.broadcast %108 : vector<1x256xf32> to vector<8x256xf32>
    %110 = arith.mulf %107, %109 : vector<8x256xf32>
    %111 = vector.broadcast %106 : vector<8x1xf32> to vector<8x256xf32>
    %112 = arith.mulf %111, %110 : vector<8x256xf32>
    %113 = arith.addf %105, %112 : vector<8x256xf32>
    %114 = vector.extract_strided_slice %70 {offsets = [0, 6], sizes = [8, 1], strides = [1, 1]} : vector<8x9xf32> to vector<8x1xf32>
    %c241_i32_38 = arith.constant 241 : i32
    %115 = tpu.dynamic_rotate %69 by %c241_i32_38 dim 1 : vector<8x256xf32>, i32 -> vector<8x256xf32>
    %116 = vector.extract_strided_slice %0 {offsets = [6, 0], sizes = [1, 256], strides = [1, 1]} : vector<9x256xf32> to vector<1x256xf32>
    %117 = vector.broadcast %116 : vector<1x256xf32> to vector<8x256xf32>
    %118 = arith.mulf %115, %117 : vector<8x256xf32>
    %119 = vector.broadcast %114 : vector<8x1xf32> to vector<8x256xf32>
    %120 = arith.mulf %119, %118 : vector<8x256xf32>
    %121 = arith.addf %113, %120 : vector<8x256xf32>
    %122 = vector.extract_strided_slice %70 {offsets = [0, 7], sizes = [8, 1], strides = [1, 1]} : vector<8x9xf32> to vector<8x1xf32>
    %c240_i32_39 = arith.constant 240 : i32
    %123 = tpu.dynamic_rotate %69 by %c240_i32_39 dim 1 : vector<8x256xf32>, i32 -> vector<8x256xf32>
    %124 = vector.extract_strided_slice %0 {offsets = [7, 0], sizes = [1, 256], strides = [1, 1]} : vector<9x256xf32> to vector<1x256xf32>
    %125 = vector.broadcast %124 : vector<1x256xf32> to vector<8x256xf32>
    %126 = arith.mulf %123, %125 : vector<8x256xf32>
    %127 = vector.broadcast %122 : vector<8x1xf32> to vector<8x256xf32>
    %128 = arith.mulf %127, %126 : vector<8x256xf32>
    %129 = arith.addf %121, %128 : vector<8x256xf32>
    %130 = vector.extract_strided_slice %70 {offsets = [0, 8], sizes = [8, 1], strides = [1, 1]} : vector<8x9xf32> to vector<8x1xf32>
    %c239_i32_40 = arith.constant 239 : i32
    %131 = tpu.dynamic_rotate %69 by %c239_i32_40 dim 1 : vector<8x256xf32>, i32 -> vector<8x256xf32>
    %132 = vector.extract_strided_slice %0 {offsets = [8, 0], sizes = [1, 256], strides = [1, 1]} : vector<9x256xf32> to vector<1x256xf32>
    %133 = vector.broadcast %132 : vector<1x256xf32> to vector<8x256xf32>
    %134 = arith.mulf %131, %133 : vector<8x256xf32>
    %135 = vector.broadcast %130 : vector<8x1xf32> to vector<8x256xf32>
    %136 = arith.mulf %135, %134 : vector<8x256xf32>
    %137 = arith.addf %129, %136 : vector<8x256xf32>
    %138 = tpu.concatenate %69, %137 in 0 : vector<8x256xf32>, vector<8x256xf32> -> vector<16x256xf32>
    %cst_41 = arith.constant 0.000000e+00 : f32
    %139 = vector.broadcast %cst_41 : f32 to vector<16x256xf32>
    %140 = arith.maximumf %138, %139 : vector<16x256xf32>
    %c4_42 = arith.constant 4 : index
    %c0_43 = arith.constant 0 : index
    %c0_44 = arith.constant 0 : index
    %141 = vector.load %arg5[%c4_42, %c0_43, %c0_44] : memref<9x8x16xf32, #tpu.memory_space<vmem>>, vector<1x8x16xf32>
    %142 = vector.shape_cast %141 : vector<1x8x16xf32> to vector<8x16xf32>
    %cst_45 = arith.constant dense<0.000000e+00> : vector<8x256xf32>
    %143 = tpu.matmul %142, %140, %cst_45 {dimension_numbers = #tpu.dot_dimension_numbers<[1], [0], [0], [1], [0, 0, 1, 1], [], []>} : vector<8x16xf32>, vector<16x256xf32>, vector<8x256xf32> -> vector<8x256xf32>
    %c0_46 = arith.constant 0 : index
    %c0_47 = arith.constant 0 : index
    %c0_48 = arith.constant 0 : index
    %144 = vector.load %arg5[%c0_46, %c0_47, %c0_48] : memref<9x8x16xf32, #tpu.memory_space<vmem>>, vector<1x8x16xf32>
    %145 = vector.shape_cast %144 : vector<1x8x16xf32> to vector<8x16xf32>
    %c17_i32_49 = arith.constant 17 : i32
    %146 = tpu.dynamic_rotate %140 by %c17_i32_49 dim 1 : vector<16x256xf32>, i32 -> vector<16x256xf32>
    %147 = vector.extract_strided_slice %0 {offsets = [0, 0], sizes = [1, 256], strides = [1, 1]} : vector<9x256xf32> to vector<1x256xf32>
    %148 = vector.broadcast %147 : vector<1x256xf32> to vector<16x256xf32>
    %149 = arith.mulf %146, %148 : vector<16x256xf32>
    %cst_50 = arith.constant dense<0.000000e+00> : vector<8x256xf32>
    %150 = tpu.matmul %145, %149, %cst_50 {dimension_numbers = #tpu.dot_dimension_numbers<[1], [0], [0], [1], [0, 0, 1, 1], [], []>} : vector<8x16xf32>, vector<16x256xf32>, vector<8x256xf32> -> vector<8x256xf32>
    %151 = arith.addf %143, %150 : vector<8x256xf32>
    %c1_51 = arith.constant 1 : index
    %c0_52 = arith.constant 0 : index
    %c0_53 = arith.constant 0 : index
    %152 = vector.load %arg5[%c1_51, %c0_52, %c0_53] : memref<9x8x16xf32, #tpu.memory_space<vmem>>, vector<1x8x16xf32>
    %153 = vector.shape_cast %152 : vector<1x8x16xf32> to vector<8x16xf32>
    %c16_i32_54 = arith.constant 16 : i32
    %154 = tpu.dynamic_rotate %140 by %c16_i32_54 dim 1 : vector<16x256xf32>, i32 -> vector<16x256xf32>
    %155 = vector.extract_strided_slice %0 {offsets = [1, 0], sizes = [1, 256], strides = [1, 1]} : vector<9x256xf32> to vector<1x256xf32>
    %156 = vector.broadcast %155 : vector<1x256xf32> to vector<16x256xf32>
    %157 = arith.mulf %154, %156 : vector<16x256xf32>
    %cst_55 = arith.constant dense<0.000000e+00> : vector<8x256xf32>
    %158 = tpu.matmul %153, %157, %cst_55 {dimension_numbers = #tpu.dot_dimension_numbers<[1], [0], [0], [1], [0, 0, 1, 1], [], []>} : vector<8x16xf32>, vector<16x256xf32>, vector<8x256xf32> -> vector<8x256xf32>
    %159 = arith.addf %151, %158 : vector<8x256xf32>
    %c2_56 = arith.constant 2 : index
    %c0_57 = arith.constant 0 : index
    %c0_58 = arith.constant 0 : index
    %160 = vector.load %arg5[%c2_56, %c0_57, %c0_58] : memref<9x8x16xf32, #tpu.memory_space<vmem>>, vector<1x8x16xf32>
    %161 = vector.shape_cast %160 : vector<1x8x16xf32> to vector<8x16xf32>
    %c15_i32_59 = arith.constant 15 : i32
    %162 = tpu.dynamic_rotate %140 by %c15_i32_59 dim 1 : vector<16x256xf32>, i32 -> vector<16x256xf32>
    %163 = vector.extract_strided_slice %0 {offsets = [2, 0], sizes = [1, 256], strides = [1, 1]} : vector<9x256xf32> to vector<1x256xf32>
    %164 = vector.broadcast %163 : vector<1x256xf32> to vector<16x256xf32>
    %165 = arith.mulf %162, %164 : vector<16x256xf32>
    %cst_60 = arith.constant dense<0.000000e+00> : vector<8x256xf32>
    %166 = tpu.matmul %161, %165, %cst_60 {dimension_numbers = #tpu.dot_dimension_numbers<[1], [0], [0], [1], [0, 0, 1, 1], [], []>} : vector<8x16xf32>, vector<16x256xf32>, vector<8x256xf32> -> vector<8x256xf32>
    %167 = arith.addf %159, %166 : vector<8x256xf32>
    %c3_61 = arith.constant 3 : index
    %c0_62 = arith.constant 0 : index
    %c0_63 = arith.constant 0 : index
    %168 = vector.load %arg5[%c3_61, %c0_62, %c0_63] : memref<9x8x16xf32, #tpu.memory_space<vmem>>, vector<1x8x16xf32>
    %169 = vector.shape_cast %168 : vector<1x8x16xf32> to vector<8x16xf32>
    %c1_i32_64 = arith.constant 1 : i32
    %170 = tpu.dynamic_rotate %140 by %c1_i32_64 dim 1 : vector<16x256xf32>, i32 -> vector<16x256xf32>
    %171 = vector.extract_strided_slice %0 {offsets = [3, 0], sizes = [1, 256], strides = [1, 1]} : vector<9x256xf32> to vector<1x256xf32>
    %172 = vector.broadcast %171 : vector<1x256xf32> to vector<16x256xf32>
    %173 = arith.mulf %170, %172 : vector<16x256xf32>
    %cst_65 = arith.constant dense<0.000000e+00> : vector<8x256xf32>
    %174 = tpu.matmul %169, %173, %cst_65 {dimension_numbers = #tpu.dot_dimension_numbers<[1], [0], [0], [1], [0, 0, 1, 1], [], []>} : vector<8x16xf32>, vector<16x256xf32>, vector<8x256xf32> -> vector<8x256xf32>
    %175 = arith.addf %167, %174 : vector<8x256xf32>
    %c5_66 = arith.constant 5 : index
    %c0_67 = arith.constant 0 : index
    %c0_68 = arith.constant 0 : index
    %176 = vector.load %arg5[%c5_66, %c0_67, %c0_68] : memref<9x8x16xf32, #tpu.memory_space<vmem>>, vector<1x8x16xf32>
    %177 = vector.shape_cast %176 : vector<1x8x16xf32> to vector<8x16xf32>
    %c255_i32_69 = arith.constant 255 : i32
    %178 = tpu.dynamic_rotate %140 by %c255_i32_69 dim 1 : vector<16x256xf32>, i32 -> vector<16x256xf32>
    %179 = vector.extract_strided_slice %0 {offsets = [5, 0], sizes = [1, 256], strides = [1, 1]} : vector<9x256xf32> to vector<1x256xf32>
    %180 = vector.broadcast %179 : vector<1x256xf32> to vector<16x256xf32>
    %181 = arith.mulf %178, %180 : vector<16x256xf32>
    %cst_70 = arith.constant dense<0.000000e+00> : vector<8x256xf32>
    %182 = tpu.matmul %177, %181, %cst_70 {dimension_numbers = #tpu.dot_dimension_numbers<[1], [0], [0], [1], [0, 0, 1, 1], [], []>} : vector<8x16xf32>, vector<16x256xf32>, vector<8x256xf32> -> vector<8x256xf32>
    %183 = arith.addf %175, %182 : vector<8x256xf32>
    %c6_71 = arith.constant 6 : index
    %c0_72 = arith.constant 0 : index
    %c0_73 = arith.constant 0 : index
    %184 = vector.load %arg5[%c6_71, %c0_72, %c0_73] : memref<9x8x16xf32, #tpu.memory_space<vmem>>, vector<1x8x16xf32>
    %185 = vector.shape_cast %184 : vector<1x8x16xf32> to vector<8x16xf32>
    %c241_i32_74 = arith.constant 241 : i32
    %186 = tpu.dynamic_rotate %140 by %c241_i32_74 dim 1 : vector<16x256xf32>, i32 -> vector<16x256xf32>
    %187 = vector.extract_strided_slice %0 {offsets = [6, 0], sizes = [1, 256], strides = [1, 1]} : vector<9x256xf32> to vector<1x256xf32>
    %188 = vector.broadcast %187 : vector<1x256xf32> to vector<16x256xf32>
    %189 = arith.mulf %186, %188 : vector<16x256xf32>
    %cst_75 = arith.constant dense<0.000000e+00> : vector<8x256xf32>
    %190 = tpu.matmul %185, %189, %cst_75 {dimension_numbers = #tpu.dot_dimension_numbers<[1], [0], [0], [1], [0, 0, 1, 1], [], []>} : vector<8x16xf32>, vector<16x256xf32>, vector<8x256xf32> -> vector<8x256xf32>
    %191 = arith.addf %183, %190 : vector<8x256xf32>
    %c7_76 = arith.constant 7 : index
    %c0_77 = arith.constant 0 : index
    %c0_78 = arith.constant 0 : index
    %192 = vector.load %arg5[%c7_76, %c0_77, %c0_78] : memref<9x8x16xf32, #tpu.memory_space<vmem>>, vector<1x8x16xf32>
    %193 = vector.shape_cast %192 : vector<1x8x16xf32> to vector<8x16xf32>
    %c240_i32_79 = arith.constant 240 : i32
    %194 = tpu.dynamic_rotate %140 by %c240_i32_79 dim 1 : vector<16x256xf32>, i32 -> vector<16x256xf32>
    %195 = vector.extract_strided_slice %0 {offsets = [7, 0], sizes = [1, 256], strides = [1, 1]} : vector<9x256xf32> to vector<1x256xf32>
    %196 = vector.broadcast %195 : vector<1x256xf32> to vector<16x256xf32>
    %197 = arith.mulf %194, %196 : vector<16x256xf32>
    %cst_80 = arith.constant dense<0.000000e+00> : vector<8x256xf32>
    %198 = tpu.matmul %193, %197, %cst_80 {dimension_numbers = #tpu.dot_dimension_numbers<[1], [0], [0], [1], [0, 0, 1, 1], [], []>} : vector<8x16xf32>, vector<16x256xf32>, vector<8x256xf32> -> vector<8x256xf32>
    %199 = arith.addf %191, %198 : vector<8x256xf32>
    %c8_81 = arith.constant 8 : index
    %c0_82 = arith.constant 0 : index
    %c0_83 = arith.constant 0 : index
    %200 = vector.load %arg5[%c8_81, %c0_82, %c0_83] : memref<9x8x16xf32, #tpu.memory_space<vmem>>, vector<1x8x16xf32>
    %201 = vector.shape_cast %200 : vector<1x8x16xf32> to vector<8x16xf32>
    %c239_i32_84 = arith.constant 239 : i32
    %202 = tpu.dynamic_rotate %140 by %c239_i32_84 dim 1 : vector<16x256xf32>, i32 -> vector<16x256xf32>
    %203 = vector.extract_strided_slice %0 {offsets = [8, 0], sizes = [1, 256], strides = [1, 1]} : vector<9x256xf32> to vector<1x256xf32>
    %204 = vector.broadcast %203 : vector<1x256xf32> to vector<16x256xf32>
    %205 = arith.mulf %202, %204 : vector<16x256xf32>
    %cst_85 = arith.constant dense<0.000000e+00> : vector<8x256xf32>
    %206 = tpu.matmul %201, %205, %cst_85 {dimension_numbers = #tpu.dot_dimension_numbers<[1], [0], [0], [1], [0, 0, 1, 1], [], []>} : vector<8x16xf32>, vector<16x256xf32>, vector<8x256xf32> -> vector<8x256xf32>
    %207 = arith.addf %199, %206 : vector<8x256xf32>
    %c0_86 = arith.constant 0 : index
    %c0_87 = arith.constant 0 : index
    %208 = vector.load %arg6[%c0_86, %c0_87] : memref<8x9xf32, #tpu.memory_space<vmem>>, vector<8x9xf32>
    %209 = vector.extract_strided_slice %208 {offsets = [0, 4], sizes = [8, 1], strides = [1, 1]} : vector<8x9xf32> to vector<8x1xf32>
    %210 = vector.broadcast %209 : vector<8x1xf32> to vector<8x256xf32>
    %211 = arith.mulf %210, %207 : vector<8x256xf32>
    %212 = vector.extract_strided_slice %208 {offsets = [0, 0], sizes = [8, 1], strides = [1, 1]} : vector<8x9xf32> to vector<8x1xf32>
    %c17_i32_88 = arith.constant 17 : i32
    %213 = tpu.dynamic_rotate %207 by %c17_i32_88 dim 1 : vector<8x256xf32>, i32 -> vector<8x256xf32>
    %214 = vector.extract_strided_slice %0 {offsets = [0, 0], sizes = [1, 256], strides = [1, 1]} : vector<9x256xf32> to vector<1x256xf32>
    %215 = vector.broadcast %214 : vector<1x256xf32> to vector<8x256xf32>
    %216 = arith.mulf %213, %215 : vector<8x256xf32>
    %217 = vector.broadcast %212 : vector<8x1xf32> to vector<8x256xf32>
    %218 = arith.mulf %217, %216 : vector<8x256xf32>
    %219 = arith.addf %211, %218 : vector<8x256xf32>
    %220 = vector.extract_strided_slice %208 {offsets = [0, 1], sizes = [8, 1], strides = [1, 1]} : vector<8x9xf32> to vector<8x1xf32>
    %c16_i32_89 = arith.constant 16 : i32
    %221 = tpu.dynamic_rotate %207 by %c16_i32_89 dim 1 : vector<8x256xf32>, i32 -> vector<8x256xf32>
    %222 = vector.extract_strided_slice %0 {offsets = [1, 0], sizes = [1, 256], strides = [1, 1]} : vector<9x256xf32> to vector<1x256xf32>
    %223 = vector.broadcast %222 : vector<1x256xf32> to vector<8x256xf32>
    %224 = arith.mulf %221, %223 : vector<8x256xf32>
    %225 = vector.broadcast %220 : vector<8x1xf32> to vector<8x256xf32>
    %226 = arith.mulf %225, %224 : vector<8x256xf32>
    %227 = arith.addf %219, %226 : vector<8x256xf32>
    %228 = vector.extract_strided_slice %208 {offsets = [0, 2], sizes = [8, 1], strides = [1, 1]} : vector<8x9xf32> to vector<8x1xf32>
    %c15_i32_90 = arith.constant 15 : i32
    %229 = tpu.dynamic_rotate %207 by %c15_i32_90 dim 1 : vector<8x256xf32>, i32 -> vector<8x256xf32>
    %230 = vector.extract_strided_slice %0 {offsets = [2, 0], sizes = [1, 256], strides = [1, 1]} : vector<9x256xf32> to vector<1x256xf32>
    %231 = vector.broadcast %230 : vector<1x256xf32> to vector<8x256xf32>
    %232 = arith.mulf %229, %231 : vector<8x256xf32>
    %233 = vector.broadcast %228 : vector<8x1xf32> to vector<8x256xf32>
    %234 = arith.mulf %233, %232 : vector<8x256xf32>
    %235 = arith.addf %227, %234 : vector<8x256xf32>
    %236 = vector.extract_strided_slice %208 {offsets = [0, 3], sizes = [8, 1], strides = [1, 1]} : vector<8x9xf32> to vector<8x1xf32>
    %c1_i32_91 = arith.constant 1 : i32
    %237 = tpu.dynamic_rotate %207 by %c1_i32_91 dim 1 : vector<8x256xf32>, i32 -> vector<8x256xf32>
    %238 = vector.extract_strided_slice %0 {offsets = [3, 0], sizes = [1, 256], strides = [1, 1]} : vector<9x256xf32> to vector<1x256xf32>
    %239 = vector.broadcast %238 : vector<1x256xf32> to vector<8x256xf32>
    %240 = arith.mulf %237, %239 : vector<8x256xf32>
    %241 = vector.broadcast %236 : vector<8x1xf32> to vector<8x256xf32>
    %242 = arith.mulf %241, %240 : vector<8x256xf32>
    %243 = arith.addf %235, %242 : vector<8x256xf32>
    %244 = vector.extract_strided_slice %208 {offsets = [0, 5], sizes = [8, 1], strides = [1, 1]} : vector<8x9xf32> to vector<8x1xf32>
    %c255_i32_92 = arith.constant 255 : i32
    %245 = tpu.dynamic_rotate %207 by %c255_i32_92 dim 1 : vector<8x256xf32>, i32 -> vector<8x256xf32>
    %246 = vector.extract_strided_slice %0 {offsets = [5, 0], sizes = [1, 256], strides = [1, 1]} : vector<9x256xf32> to vector<1x256xf32>
    %247 = vector.broadcast %246 : vector<1x256xf32> to vector<8x256xf32>
    %248 = arith.mulf %245, %247 : vector<8x256xf32>
    %249 = vector.broadcast %244 : vector<8x1xf32> to vector<8x256xf32>
    %250 = arith.mulf %249, %248 : vector<8x256xf32>
    %251 = arith.addf %243, %250 : vector<8x256xf32>
    %252 = vector.extract_strided_slice %208 {offsets = [0, 6], sizes = [8, 1], strides = [1, 1]} : vector<8x9xf32> to vector<8x1xf32>
    %c241_i32_93 = arith.constant 241 : i32
    %253 = tpu.dynamic_rotate %207 by %c241_i32_93 dim 1 : vector<8x256xf32>, i32 -> vector<8x256xf32>
    %254 = vector.extract_strided_slice %0 {offsets = [6, 0], sizes = [1, 256], strides = [1, 1]} : vector<9x256xf32> to vector<1x256xf32>
    %255 = vector.broadcast %254 : vector<1x256xf32> to vector<8x256xf32>
    %256 = arith.mulf %253, %255 : vector<8x256xf32>
    %257 = vector.broadcast %252 : vector<8x1xf32> to vector<8x256xf32>
    %258 = arith.mulf %257, %256 : vector<8x256xf32>
    %259 = arith.addf %251, %258 : vector<8x256xf32>
    %260 = vector.extract_strided_slice %208 {offsets = [0, 7], sizes = [8, 1], strides = [1, 1]} : vector<8x9xf32> to vector<8x1xf32>
    %c240_i32_94 = arith.constant 240 : i32
    %261 = tpu.dynamic_rotate %207 by %c240_i32_94 dim 1 : vector<8x256xf32>, i32 -> vector<8x256xf32>
    %262 = vector.extract_strided_slice %0 {offsets = [7, 0], sizes = [1, 256], strides = [1, 1]} : vector<9x256xf32> to vector<1x256xf32>
    %263 = vector.broadcast %262 : vector<1x256xf32> to vector<8x256xf32>
    %264 = arith.mulf %261, %263 : vector<8x256xf32>
    %265 = vector.broadcast %260 : vector<8x1xf32> to vector<8x256xf32>
    %266 = arith.mulf %265, %264 : vector<8x256xf32>
    %267 = arith.addf %259, %266 : vector<8x256xf32>
    %268 = vector.extract_strided_slice %208 {offsets = [0, 8], sizes = [8, 1], strides = [1, 1]} : vector<8x9xf32> to vector<8x1xf32>
    %c239_i32_95 = arith.constant 239 : i32
    %269 = tpu.dynamic_rotate %207 by %c239_i32_95 dim 1 : vector<8x256xf32>, i32 -> vector<8x256xf32>
    %270 = vector.extract_strided_slice %0 {offsets = [8, 0], sizes = [1, 256], strides = [1, 1]} : vector<9x256xf32> to vector<1x256xf32>
    %271 = vector.broadcast %270 : vector<1x256xf32> to vector<8x256xf32>
    %272 = arith.mulf %269, %271 : vector<8x256xf32>
    %273 = vector.broadcast %268 : vector<8x1xf32> to vector<8x256xf32>
    %274 = arith.mulf %273, %272 : vector<8x256xf32>
    %275 = arith.addf %267, %274 : vector<8x256xf32>
    %276 = tpu.concatenate %207, %275 in 0 : vector<8x256xf32>, vector<8x256xf32> -> vector<16x256xf32>
    %cst_96 = arith.constant 0.000000e+00 : f32
    %277 = vector.broadcast %cst_96 : f32 to vector<16x256xf32>
    %278 = arith.maximumf %276, %277 : vector<16x256xf32>
    %c0_97 = arith.constant 0 : index
    %c0_98 = arith.constant 0 : index
    %c0_99 = arith.constant 0 : index
    %279 = vector.load %arg7[%c0_97, %c0_98, %c0_99] : memref<1x16x256xf32, #tpu.memory_space<vmem>>, vector<1x16x256xf32>
    %280 = vector.shape_cast %279 : vector<1x16x256xf32> to vector<16x256xf32>
    %281 = vector.shape_cast %278 : vector<16x256xf32> to vector<1x16x256xf32>
    tpu.vector_store %arg7[%c0_97, %c0_98, %c0_99], %281 {strides = array<i32>} : memref<1x16x256xf32, #tpu.memory_space<vmem>>, vector<1x16x256xf32>,
    return
  }
  func.func @transform_0(%arg0: i32) -> (i32, i32, i32) {
    %c0_i32 = arith.constant 0 : i32
    %c0_i32_0 = arith.constant 0 : i32
    %c0_i32_1 = arith.constant 0 : i32
    return %arg0, %c0_i32, %c0_i32_0 : i32, i32, i32
  }
  func.func @transform_1(%arg0: i32) -> (i32, i32) {
    %c0_i32 = arith.constant 0 : i32
    %c0_i32_0 = arith.constant 0 : i32
    %c0_i32_1 = arith.constant 0 : i32
    return %c0_i32, %c0_i32_0 : i32, i32
  }
  func.func @transform_2(%arg0: i32) -> (i32, i32, i32) {
    %c0_i32 = arith.constant 0 : i32
    %c0_i32_0 = arith.constant 0 : i32
    %c0_i32_1 = arith.constant 0 : i32
    %c0_i32_2 = arith.constant 0 : i32
    return %c0_i32, %c0_i32_0, %c0_i32_1 : i32, i32, i32
  }
  func.func @transform_3(%arg0: i32) -> (i32, i32) {
    %c0_i32 = arith.constant 0 : i32
    %c0_i32_0 = arith.constant 0 : i32
    %c0_i32_1 = arith.constant 0 : i32
    return %c0_i32, %c0_i32_0 : i32, i32
  }
  func.func @transform_4(%arg0: i32) -> (i32, i32, i32) {
    %c0_i32 = arith.constant 0 : i32
    %c0_i32_0 = arith.constant 0 : i32
    %c0_i32_1 = arith.constant 0 : i32
    %c0_i32_2 = arith.constant 0 : i32
    return %c0_i32, %c0_i32_0, %c0_i32_1 : i32, i32, i32
  }
  func.func @transform_5(%arg0: i32) -> (i32, i32) {
    %c0_i32 = arith.constant 0 : i32
    %c0_i32_0 = arith.constant 0 : i32
    %c0_i32_1 = arith.constant 0 : i32
    return %c0_i32, %c0_i32_0 : i32, i32
  }
  func.func @transform_6(%arg0: i32) -> (i32, i32, i32) {
    %c0_i32 = arith.constant 0 : i32
    %c0_i32_0 = arith.constant 0 : i32
    %c0_i32_1 = arith.constant 0 : i32
    return %arg0, %c0_i32, %c0_i32_0 : i32, i32, i32
  }
}

</mosaic_0001>

<bundles_post_ra>
// kernel: tpu_custom_call.1
= control target key start
LH: loop header
LB: loop body
LE: loop exit
PB: predicated region body
PF: predicated region fallthrough
CT: control target
= control target key end

     0   :  { %11 = vsyncpa [#allocation3], 0  ;;  %s3324_s0 = inlined_call_operand.vmem [shape: f32[2,8,256], index: 0, kind: input, shape index: {}]   ;;  %s3325_s1 = inlined_call_operand.vmem [shape: f32[9,256], index: 1, kind: input, shape index: {}]   ;;  %s3326_s2 = inlined_call_operand.vmem [shape: f32[9,8,8], index: 2, kind: input, shape index: {}]   ;;  %s3327_s3 = inlined_call_operand.vmem [shape: f32[8,9], index: 3, kind: input, shape index: {}]   ;;  %s3328_s4 = inlined_call_operand.vmem [shape: f32[9,8,16], index: 4, kind: input, shape index: {}]   ;;  %s3329_s5 = inlined_call_operand.vmem [shape: f32[8,9], index: 5, kind: input, shape index: {}]   ;;  %s3330_s6 = inlined_call_operand.hbm [shape: f32[2,16,256], index: 6, kind: output, shape index: {}]  }
   0x1   :  { %13 = vsyncpa [#allocation3 + $0x1], 0  ;;  %s2591_s21 = smov 0   ;;  %s2593_s22 = smov 0  }
   0x2   :  { %s2595_s23 = smov 0   ;;  %s2597_s24 = smov 0  }
   0x3 LB: > { %s2612_s25 = sadd.s32 4294967295, %s2534_s24   ;;  %s2278_s26 = sadd.s32 4294967294, %s2534_s24   ;;  %s2534_s24 = sphi %s2597_s24, %s3336_s24   ;;  %s2530_s23 = sphi %s2595_s23, %s3335_s23   ;;  %s2526_s22 = sphi %s2593_s22, %s3334_s22   ;;  %s2522_s21 = sphi %s2591_s21, %s3333_s21  }
   0x4   : > { %s2616_s27 = sadd.s32 1, %s2534_s24   ;;  %s157_s28 = sadd.s32 1, %s2530_s23 }
   0x5   : > { %s154_s29 = ssub.s32 %s2534_s24, %s2616_s27  ;;  %p167_p0 = scmp.ne.s32.totalorder %s2530_s23, %s2526_s22 }
   0x6   : > { %p155_p1 = scmp.eq.s32.totalorder %s154_s29, 0  ;;  %p168_p2 = scmp.eq.s32.totalorder %s2612_s25, 1 }
   0x7   : > { %p173_p3 = scmp.ne.s32.totalorder %s2526_s22, %s2522_s21  ;;  %p174_p4 = scmp.eq.s32.totalorder %s2278_s26, 1 }
   0x8   : > { %s2627_s30 = scalar_select %p155_p1, %s2530_s23, %s157_s28  }
   0x9   : > { %p2629_p5 = por %p168_p2, %p167_p0  ;;  %p2633_p6 = por %p174_p4, %p173_p3 }
   0xa   : > { %p2281_p7 = scmp.ge.s32.totalorder %s2534_s24, 1  ;;  %p215_p8 = scmp.lt.s32.totalorder %s2534_s24, 3 }
   0xc   : > { %p216_p9 = pnand %p2281_p7, %p215_p8 }
   0xd   : > { %p245_p10 = scmp.lt.s32.totalorder (!%p216_p9), %s2612_s25, 1  ;;  %v2536_v0 = vmov (!%p216_p9), 0.0   ;;  %s2537_s14 = smov (!%p216_p9), 17   ;;  %v2685_v3 = vld [vmem:[%s3327_s3] sm:$0xff] (!%p216_p9)  ;;  %v2545_v4 = vmov (!%p216_p9), 4   ;;  %v2546_v5 = vmov (!%p216_p9), 0   ;;  %v263_v11 = vlaneseq (!%p216_p9) }
   0xe   : > { %219 = sbr.rel (%p216_p9) target bundleno = 1197 (0x4ad), region = 44  ;;  %346 = vmatprep.mubr.f32.mxu0 (!%p216_p9), %v2536_v0  ;;  %1319 = vmatprep.mubr.f32.mxu1 (!%p216_p9), %v2536_v0  ;;  %s2538_s15 = smov (!%p216_p9), 16   ;;  %v2547_v6 = vmov (!%p216_p9), 2   ;;  %v2548_v7 = vmov (!%p216_p9), 1   ;;  %v2549_v8 = vmov (!%p216_p9), 3   ;;  %v2550_v9 = vmov (!%p216_p9), 5  }
   0xf   : > { %s2539_s16 = smov (!%p216_p9), 15   ;;  %s2540_s17 = smov (!%p216_p9), 1   ;;  %2454 = vset.pattern.permute.xlu0 (!%p216_p9), %v2545_v4  ;;  %2455 = vset.pattern.permute.xlu1 (!%p216_p9), %v2546_v5  ;;  %v2551_v10 = vmov (!%p216_p9), 6   ;;  %v2700_v12 = vshrl.u32 (!%p216_p9), %v263_v11, 7  ;;  %v2702_v13 = vand.u32 (!%p216_p9), 127, %v263_v11  ;;  %v2708_v15 = vld [vmem:[%s3325_s1 + $0x8] sm:$0xff] (!%p216_p9) }
  0x10   : > { %s2541_s18 = smov (!%p216_p9), 127   ;;  %s2542_s19 = smov (!%p216_p9), 113   ;;  %v2713_v16 = vld [vmem:[%s3325_s1] sm:$0xff] (!%p216_p9)  ;;  %vm278_vm2 = vcmask (!%p216_p9), 64512   ;;  %v2288_v50 = vld [vmem:[%s3326_s2 + $0x8] sm:$0xff] (!%p216_p9)  ;;  %v2290_v60 = vld [vmem:[%s3326_s2 + $0x10] sm:$0xff] (!%p216_p9) }
  0x11   : > { %s2543_s20 = smov (!%p216_p9), 112   ;;  %s2544_s26 = smov (!%p216_p9), 111   ;;  %v270_v14 = vsub.s32 (!%p216_p9), 0, %v2700_v12  ;;  %v438_v19 = vsub.s32 (!%p216_p9), 1, %v2700_v12  ;;  %vm265_vm0 = vcmp.lt.s32.totalorder (!%p216_p9), %v2702_v13, 17  ;;  %vm433_vm1 = vcmp.lt.s32.totalorder (!%p216_p9), %v2702_v13, 16 }
  0x12   : > { %v258_v30 = vld [vmem:[%s3326_s2] sm:$0xff] (!%p216_p9)  ;;  %v533_v32 = vsub.s32 (!%p216_p9), 2, %v2700_v12  ;;  %vm528_vm3 = vcmp.lt.s32.totalorder (!%p216_p9), %v2702_v13, 15  ;;  %v628_v42 = vsub.s32 (!%p216_p9), 3, %v2700_v12  ;;  %vm623_vm4 = vcmp.lt.s32.totalorder (!%p216_p9), %v2702_v13, 1 }
  0x13   : > { %v2718_v20 = vrot.slane (!%p216_p9), %v2708_v15, %v270_v14  ;;  %v2721_v21 = vrot.slane (!%p216_p9), %v2713_v16, %v270_v14  ;;  %v2725_v24 = vrot.slane (!%p216_p9), %v2708_v15, %v438_v19  ;;  %v2744_v35 = vrot.slane (!%p216_p9), %v2713_v16, %v438_v19  ;;  %v2285_v40 = vld [vmem:[%s3326_s2 + $0x20] sm:$0xff] (!%p216_p9) }
  0x14   : > { %v2751_v37 = vrot.slane (!%p216_p9), %v2708_v15, %v533_v32  ;;  %v2764_v45 = vrot.slane (!%p216_p9), %v2713_v16, %v533_v32  ;;  %v2770_v47 = vrot.slane (!%p216_p9), %v2708_v15, %v628_v42  ;;  %v723_v52 = vsub.s32 (!%p216_p9), 5, %v2700_v12 }
  0x15   : > { %s246_s9 = scalar_select %p245_p10, %s2612_s25, 1  ;;  %vm718_vm5 = vcmp.lt.s32.totalorder %v2702_v13, 127  ;;  %v2783_v55 = vrot.slane %v2713_v16, %v628_v42  ;;  %v818_v62 = vsub.s32 6, %v2700_v12  ;;  %vm813_vm6 = vcmp.lt.s32.totalorder %v2702_v13, 113 }
  0x16   : > { %v2789_v57 = vrot.slane %v2708_v15, %v723_v52  ;;  %vm908_vm7 = vcmp.lt.s32.totalorder %v2702_v13, 112  ;;  %vm1003_vm8 = vcmp.lt.s32.totalorder %v2702_v13, 111  ;;  %vm1251_vm9 = vcmask 130048  }
  0x17   : > { %s2326_s10 = sshll.u32 %s246_s9, 4  ;;  %v2808_v11 = vrot.slane %v2708_v15, %v818_v62 }
  0x18   : > { %s249_s13 = scalar_lea.vmem %s3324_s0, %s2326_s10 }
  0x19   : > { %v2646_v1 = vld [vmem:[%s249_s13] sm:$0xff]  ;;  %v2652_v2 = vld [vmem:[%s249_s13 + $0x8] sm:$0xff]  ;;  %s242_s13 = sand.u32 1, %s2526_s22  }
  0x1a   : > { %259 = vrot.lane.b32.xlu0 %v2646_v1, %s2537_s14  ;;  %429 = vrot.lane.b32.xlu1 %v2646_v1, %s2538_s15  ;;  %s2282_s28 = sshll.u32 %s242_s13, 5 }
  0x1b   : > { %s3200_s29 = scalar_lea.vmem [#allocation2], %s2282_s28 }
  0x1e   : > { %261 = vrot.lane.b32.xlu0 %v2652_v2, %s2537_s14  ;;  %431 = vrot.lane.b32.xlu1 %v2652_v2, %s2538_s15 }
  0x22   : > { %526 = vrot.lane.b32.xlu1 %v2652_v2, %s2539_s16  ;;  %524 = vrot.lane.b32.xlu0 %v2646_v1, %s2539_s16 }
  0x26   : > { %621 = vrot.lane.b32.xlu1 %v2652_v2, %s2540_s17  ;;  %619 = vrot.lane.b32.xlu0 %v2646_v1, %s2540_s17 }
  0x2a   : > { %716 = vrot.lane.b32.xlu1 %v2652_v2, %s2541_s18  ;;  %714 = vrot.lane.b32.xlu0 %v2646_v1, %s2541_s18 }
  0x2e   : > { %811 = vrot.lane.b32.xlu1 %v2652_v2, %s2542_s19  ;;  %809 = vrot.lane.b32.xlu0 %v2646_v1, %s2542_s19 }
  0x32   : > { %906 = vrot.lane.b32.xlu1 %v2652_v2, %s2543_s20  ;;  %904 = vrot.lane.b32.xlu0 %v2646_v1, %s2543_s20 }
  0x36   : > { %1001 = vrot.lane.b32.xlu1 %v2652_v2, %s2544_s26  ;;  %999 = vrot.lane.b32.xlu0 %v2646_v1, %s2544_s26 }
  0x3a   : > { %1095 = vperm.xlu0 %2454, %v2685_v3   ;;  %1109 = vperm.xlu1 %2455, %v2685_v3  }
  0x3e   : > { %2457 = vset.pattern.permute.xlu0 %v2547_v6  ;;  %2456 = vset.pattern.permute.xlu1 %v2548_v7 }
  0x3f   : > { %1141 = vperm.xlu0 %2457, %v2685_v3   ;;  %1125 = vperm.xlu1 %2456, %v2685_v3  }
  0x43   : > { %2458 = vset.pattern.permute.xlu0 %v2549_v8  ;;  %2464 = vset.pattern.permute.xlu1 %v2546_v5 }
  0x44   : > { %1157 = vperm.xlu0 %2458, %v2685_v3  }
  0x48   : > { %2459 = vset.pattern.permute.xlu0 %v2550_v9 }
  0x49   : > { %1173 = vperm.xlu0 %2459, %v2685_v3  }
  0x4d   : > { %2460 = vset.pattern.permute.xlu0 %v2551_v10 }
  0x4e   : > { %1189 = vperm.xlu0 %2460, %v2685_v3  }
  0x8c   : > { %v260_v17 = vpop.permute.xlu0 %259  ;;  %v430_v18 = vpop.permute.xlu1 %429 }
  0x90   : > { %v262_v22 = vpop.permute.xlu0 %261  ;;  %v432_v23 = vpop.permute.xlu1 %431 }
  0x91   : > { %v267_v25 = vsel %vm265_vm0, %v262_v22, %v260_v17  ;;  %v266_v26 = vsel %vm265_vm0, %v260_v17, %v262_v22  ;;  %v434_v27 = vsel %vm433_vm1, %v430_v18, %v432_v23  ;;  %v435_v36 = vsel %vm433_vm1, %v432_v23, %v430_v18  ;;  %v2292_v18 = vld [vmem:[%s3326_s2 + $0x18] sm:$0xff] }
  0x92   : > { %v277_v28 = vmul.f32 %v2718_v20, %v266_v26  ;;  %v276_v29 = vmul.f32 %v2721_v21, %v267_v25  ;;  %v445_v31 = vmul.f32 %v2725_v24, %v434_v27  ;;  %v444_v39 = vmul.f32 %v2744_v35, %v435_v36  ;;  %v2847_v36 = vld [vmem:[%s3325_s1 + $0x18] ss:$0 sm:$0xff] }
  0x93   : > { %v913_v22 = vsub.s32 7, %v2700_v12  ;;  %v2821_v26 = vrot.slane %v2713_v16, %v818_v62 }
  0x94   : > { %282 = vmatprep.subr.mxu0 %v277_v28  ;;  %v527_v33 = vpop.permute.xlu1 %526  ;;  %v525_v34 = vpop.permute.xlu0 %524 }
  0x95   : > { %283 = vmatpush1.msra.mxu0 %v276_v29  ;;  %v529_v38 = vsel %vm528_vm3, %v525_v34, %v527_v33  ;;  %v530_v46 = vsel %vm528_vm3, %v527_v33, %v525_v34  ;;  %v2827_v28 = vrot.slane %v2708_v15, %v913_v22  ;;  %v2839_v15 = vrot.slane %v2713_v16, %v913_v22 }
  0x96   : > { %2286 = vmatmul.mubr.msk.f32.vlgmr.msra.gmra.mrb[0].mxu0 %vm278_vm2, %v258_v30  ;;  %356 = vmatprep.subr.mxu0 %v2652_v2  ;;  %v540_v41 = vmul.f32 %v2751_v37, %v529_v38  ;;  %v539_v49 = vmul.f32 %v2764_v45, %v530_v46  ;;  %v2802_v2 = vrot.slane %v2713_v16, %v723_v52  ;;  %v2294_v30 = vld [vmem:[%s3326_s2 + $0x28] sm:$0xff]  ;;  %v2296_v16 = vld [vmem:[%s3326_s2 + $0x30] sm:$0xff]  ;;  %v2300_v46 = vld [vmem:[%s3326_s2 + $0x40] sm:$0xff] }
  0x97   : > { %357 = vmatpush1.msra.mxu0 %v2646_v1  ;;  %420 = vmatprep.mubr.f32.mxu0 %v2536_v0 }
  0x98   : > { %449 = vmatprep.subr.mxu0 %v445_v31  ;;  %v622_v43 = vpop.permute.xlu1 %621  ;;  %v620_v44 = vpop.permute.xlu0 %619 }
  0x99   : > { %v624_v48 = vsel %vm623_vm4, %v620_v44, %v622_v43  ;;  %v625_v56 = vsel %vm623_vm4, %v622_v43, %v620_v44  ;;  %v2298_v44 = vld [vmem:[%s3326_s2 + $0x38] sm:$0xff] }
  0x9a   : > { %v635_v51 = vmul.f32 %v2770_v47, %v624_v48  ;;  %v634_v59 = vmul.f32 %v2783_v55, %v625_v56  ;;  %v2552_v48 = vmov 7  }
  0x9b   : > { %2461 = vset.pattern.permute.xlu0 %v2552_v48 }
  0x9c   : > { %v717_v53 = vpop.permute.xlu1 %716  ;;  %v715_v54 = vpop.permute.xlu0 %714 }
  0x9d   : > { %v720_v58 = vsel %vm718_vm5, %v717_v53, %v715_v54  ;;  %v719_v5 = vsel %vm718_vm5, %v715_v54, %v717_v53 }
  0x9e   : > { %2287 = vmatmul.mubr.msk.f32.vlgmr.msra.gmra.mrb[0].mxu0 %vm278_vm2, %v2285_v40  ;;  %v730_v61 = vmul.f32 %v2789_v57, %v720_v58  ;;  %v729_v17 = vmul.f32 %v2802_v2, %v719_v5 }
  0x9f   : > { %450 = vmatpush1.msra.mxu0 %v444_v39  ;;  %513 = vmatprep.mubr.f32.mxu0 %v2536_v0 }
  0xa0   : > { %544 = vmatprep.subr.mxu0 %v540_v41  ;;  %v812_v63 = vpop.permute.xlu1 %811  ;;  %v810_v1 = vpop.permute.xlu0 %809  ;;  %v2861_v41 = vld [vmem:[%s3325_s1 + $0x10] ss:$0 sm:$0xff] }
  0xa1   : > { %v815_v14 = vsel %vm813_vm6, %v812_v63, %v810_v1  ;;  %v814_v27 = vsel %vm813_vm6, %v810_v1, %v812_v63 }
  0xa2   : > { %v825_v19 = vmul.f32 %v2808_v11, %v815_v14  ;;  %v824_v29 = vmul.f32 %v2821_v26, %v814_v27 }
  0xa4   : > { %v907_v23 = vpop.permute.xlu1 %906  ;;  %v905_v25 = vpop.permute.xlu0 %904 }
  0xa5   : > { %v910_v12 = vsel %vm908_vm7, %v907_v23, %v905_v25  ;;  %v909_v34 = vsel %vm908_vm7, %v905_v25, %v907_v23 }
  0xa6   : > { %2289 = vmatmul.mubr.msk.f32.vlgmr.msra.gmra.mrb[0].mxu0 %vm278_vm2, %v2288_v50  ;;  %v920_v31 = vmul.f32 %v2827_v28, %v910_v12  ;;  %v919_v39 = vmul.f32 %v2839_v15, %v909_v34 }
  0xa7   : > { %545 = vmatpush1.msra.mxu0 %v539_v49  ;;  %608 = vmatprep.mubr.f32.mxu0 %v2536_v0 }
  0xa8   : > { %639 = vmatprep.subr.mxu0 %v635_v51  ;;  %v1002_v32 = vpop.permute.xlu1 %1001  ;;  %v1000_v33 = vpop.permute.xlu0 %999  ;;  %v2553_v51 = vmov 8  }
  0xa9   : > { %v1005_v38 = vsel %vm1003_vm8, %v1002_v32, %v1000_v33  ;;  %v1004_v42 = vsel %vm1003_vm8, %v1000_v33, %v1002_v32 }
  0xaa   : > { %v1015_v40 = vmul.f32 %v2847_v36, %v1005_v38  ;;  %v1014_v43 = vmul.f32 %v2861_v41, %v1004_v42 }
  0xae   : > { %2291 = vmatmul.mubr.msk.f32.vlgmr.msra.gmra.mrb[0].mxu0 %vm278_vm2, %v2290_v60 }
  0xaf   : > { %640 = vmatpush1.msra.mxu0 %v634_v59  ;;  %703 = vmatprep.mubr.f32.mxu0 %v2536_v0 }
  0xb0   : > { %734 = vmatprep.subr.mxu0 %v730_v61 }
  0xb6   : > { %2293 = vmatmul.mubr.msk.f32.vlgmr.msra.gmra.mrb[0].mxu0 %vm278_vm2, %v2292_v18 }
  0xb7   : > { %735 = vmatpush1.msra.mxu0 %v729_v17  ;;  %798 = vmatprep.mubr.f32.mxu0 %v2536_v0 }
  0xb8   : > { %829 = vmatprep.subr.mxu0 %v825_v19 }
  0xb9   : > { %v1096_v56 = vpop.permute.xlu0 %1095 }
  0xbe   : > { %2295 = vmatmul.mubr.msk.f32.vlgmr.msra.gmra.mrb[0].mxu0 %vm278_vm2, %v2294_v30  ;;  %v1142_v59 = vpop.permute.xlu0 %1141 }
  0xbf   : > { %830 = vmatpush1.msra.mxu0 %v824_v29  ;;  %893 = vmatprep.mubr.f32.mxu0 %v2536_v0 }
  0xc0   : > { %924 = vmatprep.subr.mxu0 %v920_v31 }
  0xc3   : > { %v1158_v62 = vpop.permute.xlu0 %1157 }
  0xc6   : > { %2297 = vmatmul.mubr.msk.f32.vlgmr.msra.gmra.mrb[0].mxu0 %vm278_vm2, %v2296_v16 }
  0xc7   : > { %925 = vmatpush1.msra.mxu0 %v919_v39  ;;  %988 = vmatprep.mubr.f32.mxu0 %v2536_v0 }
  0xc8   : > { %1019 = vmatprep.subr.mxu0 %v1015_v40  ;;  %v1174_v1 = vpop.permute.xlu0 %1173 }
  0xcd   : > { %v1190_v17 = vpop.permute.xlu0 %1189 }
  0xce   : > { %2299 = vmatmul.mubr.msk.f32.vlgmr.msra.gmra.mrb[0].mxu0 %vm278_vm2, %v2298_v44 }
  0xcf   : > { %1020 = vmatpush1.msra.mxu0 %v1014_v43  ;;  %1083 = vmatprep.mubr.f32.mxu0 %v2536_v0 }
  0xd6   : > { %2303 = vmatmul.mubr.msk.f32.vlgmr.msra.gmra.mrb[0].mxu0 %vm278_vm2, %v2300_v46 }
 0x1a9   : > { %v2876_v49 = vpop.f32.mrb[0].mxu0 }
 0x1aa   : > { %1116 = vrot.lane.b32.xlu1 %v2876_v49, %s2538_s15  ;;  %1100 = vrot.lane.b32.xlu0 %v2876_v49, %s2537_s14  ;;  %v2882_v50 = vpop.f32.mrb[1].mxu0  ;;  %v2897_v52 = vmax.f32 %v2876_v49, 0.0 }
 0x1ab   : > { %v2904_v53 = vmax.f32 %v2882_v50, 0.0 }
 0x1ae   : > { %1132 = vrot.lane.b32.xlu1 %v2876_v49, %s2539_s16  ;;  %1205 = vperm.xlu0 %2461, %v2685_v3  }
 0x1b2   : > { %1148 = vrot.lane.b32.xlu1 %v2876_v49, %s2540_s17  ;;  %2462 = vset.pattern.permute.xlu0 %v2553_v51 }
 0x1b3   : > { %1221 = vperm.xlu0 %2462, %v2685_v3   ;;  %v1110_v3 = vpop.permute.xlu1 %1109 }
 0x1b6   : > { %1164 = vrot.lane.b32.xlu1 %v2876_v49, %s2541_s18 }
 0x1b7   : > { %1212 = vrot.lane.b32.xlu0 %v2876_v49, %s2544_s26 }
 0x1b8   : > { %2463 = vset.pattern.permute.xlu0 %v2545_v4  ;;  %v1126_v4 = vpop.permute.xlu1 %1125 }
 0x1ba   : > { %1180 = vrot.lane.b32.xlu1 %v2876_v49, %s2542_s19 }
 0x1bb   : > { %1235 = vrot.lane.b32.xlu0 %v2897_v52, %s2537_s14 }
 0x1be   : > { %1196 = vrot.lane.b32.xlu1 %v2876_v49, %s2543_s20 }
 0x1bf   : > { %1239 = vrot.lane.b32.xlu0 %v2904_v53, %s2537_s14 }
 0x1c2   : > { %1102 = vrot.lane.b32.xlu1 %v2882_v50, %s2537_s14 }
 0x1c3   : > { %1402 = vrot.lane.b32.xlu0 %v2897_v52, %s2538_s15 }
 0x1c6   : > { %1118 = vrot.lane.b32.xlu1 %v2882_v50, %s2538_s15 }
 0x1c7   : > { %1406 = vrot.lane.b32.xlu0 %v2904_v53, %s2538_s15 }
 0x1ca   : > { %1134 = vrot.lane.b32.xlu1 %v2882_v50, %s2539_s16 }
 0x1cb   : > { %1496 = vrot.lane.b32.xlu0 %v2897_v52, %s2539_s16 }
 0x1ce   : > { %1150 = vrot.lane.b32.xlu1 %v2882_v50, %s2540_s17 }
 0x1cf   : > { %1500 = vrot.lane.b32.xlu0 %v2904_v53, %s2539_s16 }
 0x1d2   : > { %1166 = vrot.lane.b32.xlu1 %v2882_v50, %s2541_s18 }
 0x1d3   : > { %1590 = vrot.lane.b32.xlu0 %v2897_v52, %s2540_s17 }
 0x1d6   : > { %1182 = vrot.lane.b32.xlu1 %v2882_v50, %s2542_s19 }
 0x1d7   : > { %1594 = vrot.lane.b32.xlu0 %v2904_v53, %s2540_s17 }
 0x1da   : > { %1198 = vrot.lane.b32.xlu1 %v2882_v50, %s2543_s20 }
 0x1db   : > { %1684 = vrot.lane.b32.xlu0 %v2897_v52, %s2541_s18 }
 0x1de   : > { %1214 = vrot.lane.b32.xlu1 %v2882_v50, %s2544_s26 }
 0x1df   : > { %1688 = vrot.lane.b32.xlu0 %v2904_v53, %s2541_s18 }
 0x1e3   : > { %1778 = vrot.lane.b32.xlu0 %v2897_v52, %s2542_s19 }
 0x1e7   : > { %1782 = vrot.lane.b32.xlu0 %v2904_v53, %s2542_s19 }
 0x1eb   : > { %1872 = vrot.lane.b32.xlu0 %v2897_v52, %s2543_s20 }
 0x1ef   : > { %1876 = vrot.lane.b32.xlu0 %v2904_v53, %s2543_s20 }
 0x1f3   : > { %1966 = vrot.lane.b32.xlu0 %v2897_v52, %s2544_s26 }
 0x1f7   : > { %1970 = vrot.lane.b32.xlu0 %v2904_v53, %s2544_s26 }
 0x21c   : > { %v1117_v54 = vpop.permute.xlu1 %1116  ;;  %v1101_v19 = vpop.permute.xlu0 %1100 }
 0x220   : > { %v1133_v58 = vpop.permute.xlu1 %1132 }
 0x224   : > { %v1149_v60 = vpop.permute.xlu1 %1148 }
 0x228   : > { %v1165_v61 = vpop.permute.xlu1 %1164 }
 0x22c   : > { %v1181_v63 = vpop.permute.xlu1 %1180 }
 0x22d   : > { %v1206_v16 = vpop.permute.xlu0 %1205 }
 0x230   : > { %v1197_v5 = vpop.permute.xlu1 %1196 }
 0x234   : > { %v1103_v14 = vpop.permute.xlu1 %1102 }
 0x235   : > { %v1104_v23 = vsel %vm265_vm0, %v1101_v19, %v1103_v14  ;;  %v1105_v25 = vsel %vm265_vm0, %v1103_v14, %v1101_v19 }
 0x236   : > { %v1106_v12 = vmul.f32 %v1105_v25, %v2721_v21  ;;  %v1107_v29 = vmul.f32 %v1104_v23, %v2718_v20 }
 0x238   : > { %v1119_v18 = vpop.permute.xlu1 %1118  ;;  %v1112_v40 = vmul.f32 %v1110_v3, %v1106_v12  ;;  %v1113_v42 = vmul.f32 %v1110_v3, %v1107_v29 }
 0x239   : > { %v1121_v27 = vsel %vm433_vm1, %v1119_v18, %v1117_v54  ;;  %v1120_v30 = vsel %vm433_vm1, %v1117_v54, %v1119_v18  ;;  %v1098_v54 = vmul.f32 %v1096_v56, %v2876_v49  ;;  %v1099_v18 = vmul.f32 %v1096_v56, %v2882_v50 }
 0x23a   : > { %v1122_v33 = vmul.f32 %v1121_v27, %v2744_v35  ;;  %v1123_v38 = vmul.f32 %v1120_v30, %v2725_v24 }
 0x23b   : > { %v1115_v27 = vadd.f32 %v1113_v42, %v1099_v18 }
 0x23c   : > { %v1135_v22 = vpop.permute.xlu1 %1134  ;;  %v1128_v19 = vmul.f32 %v1126_v4, %v1122_v33  ;;  %v1129_v23 = vmul.f32 %v1126_v4, %v1123_v38 }
 0x23d   : > { %v1137_v32 = vsel %vm528_vm3, %v1135_v22, %v1133_v58  ;;  %v1136_v34 = vsel %vm528_vm3, %v1133_v58, %v1135_v22 }
 0x23e   : > { %v1138_v43 = vmul.f32 %v1137_v32, %v2764_v45  ;;  %v1139_v14 = vmul.f32 %v1136_v34, %v2751_v37  ;;  %v1222_v32 = vpop.permute.xlu0 %1221  ;;  %v1131_v34 = vadd.f32 %v1129_v23, %v1115_v27 }
 0x240   : > { %v1151_v31 = vpop.permute.xlu1 %1150  ;;  %v1144_v12 = vmul.f32 %v1142_v59, %v1138_v43  ;;  %v1145_v30 = vmul.f32 %v1142_v59, %v1139_v14 }
 0x241   : > { %v1153_v39 = vsel %vm623_vm4, %v1151_v31, %v1149_v60  ;;  %v1152_v44 = vsel %vm623_vm4, %v1149_v60, %v1151_v31  ;;  %v1114_v60 = vadd.f32 %v1112_v40, %v1098_v54 }
 0x242   : > { %v1154_v22 = vmul.f32 %v1153_v39, %v2783_v55  ;;  %v1155_v25 = vmul.f32 %v1152_v44, %v2770_v47  ;;  %v1147_v43 = vadd.f32 %v1145_v30, %v1131_v34 }
 0x244   : > { %v1167_v46 = vpop.permute.xlu1 %1166  ;;  %v1160_v4 = vmul.f32 %v1158_v62, %v1154_v22  ;;  %v1161_v38 = vmul.f32 %v1158_v62, %v1155_v25 }
 0x245   : > { %v1168_v58 = vsel %vm718_vm5, %v1165_v61, %v1167_v46  ;;  %v1169_v3 = vsel %vm718_vm5, %v1167_v46, %v1165_v61  ;;  %v1130_v61 = vadd.f32 %v1128_v19, %v1114_v60  ;;  %v1213_v19 = vpop.permute.xlu0 %1212 }
 0x246   : > { %v1170_v49 = vmul.f32 %v1168_v58, %v2802_v2  ;;  %v1171_v31 = vmul.f32 %v1169_v3, %v2789_v57  ;;  %v1163_v62 = vadd.f32 %v1161_v38, %v1147_v43 }
 0x247   : > { %v1146_v39 = vadd.f32 %v1144_v12, %v1130_v61 }
 0x248   : > { %v1183_v29 = vpop.permute.xlu1 %1182  ;;  %v1176_v40 = vmul.f32 %v1174_v1, %v1170_v49  ;;  %v1177_v44 = vmul.f32 %v1174_v1, %v1171_v31 }
 0x249   : > { %v1184_v50 = vsel %vm813_vm6, %v1181_v63, %v1183_v29  ;;  %v1185_v56 = vsel %vm813_vm6, %v1183_v29, %v1181_v63  ;;  %v1162_v54 = vadd.f32 %v1160_v4, %v1146_v39 }
 0x24a   : > { %v1186_v33 = vmul.f32 %v1184_v50, %v2821_v26  ;;  %v1187_v42 = vmul.f32 %v1185_v56, %v2808_v11  ;;  %v1179_v60 = vadd.f32 %v1177_v44, %v1163_v62 }
 0x24b   : > { %v1178_v22 = vadd.f32 %v1176_v40, %v1162_v54 }
 0x24c   : > { %v1199_v59 = vpop.permute.xlu1 %1198  ;;  %v1192_v14 = vmul.f32 %v1190_v17, %v1186_v33  ;;  %v1193_v3 = vmul.f32 %v1190_v17, %v1187_v42 }
 0x24d   : > { %v1200_v46 = vsel %vm908_vm7, %v1197_v5, %v1199_v59  ;;  %v1201_v63 = vsel %vm908_vm7, %v1199_v59, %v1197_v5 }
 0x24e   : > { %v1202_v58 = vmul.f32 %v1200_v46, %v2839_v15  ;;  %v1203_v18 = vmul.f32 %v1201_v63, %v2827_v28  ;;  %v1194_v5 = vadd.f32 %v1192_v14, %v1178_v22  ;;  %v1195_v30 = vadd.f32 %v1193_v3, %v1179_v60  ;;  %v1234_v3 = vld [vmem:[%s3328_s4] sm:$0xff] }
 0x250   : > { %v1208_v23 = vmul.f32 %v1206_v16, %v1202_v58  ;;  %v1215_v25 = vpop.permute.xlu1 %1214  ;;  %v1209_v12 = vmul.f32 %v1206_v16, %v1203_v18  ;;  %v3033_v16 = vld [vmem:[%s3329_s5] sm:$0xff] }
 0x251   : > { %v1216_v1 = vsel %vm1003_vm8, %v1213_v19, %v1215_v25  ;;  %v1217_v27 = vsel %vm1003_vm8, %v1215_v25, %v1213_v19  ;;  %2061 = vperm.xlu0 %2463, %v3033_v16  }
 0x252   : > { %v1218_v49 = vmul.f32 %v2861_v41, %v1216_v1  ;;  %v1219_v29 = vmul.f32 %v2847_v36, %v1217_v27  ;;  %v1210_v31 = vadd.f32 %v1208_v23, %v1194_v5  ;;  %v1211_v17 = vadd.f32 %v1209_v12, %v1195_v30 }
 0x254   : > { %v1224_v50 = vmul.f32 %v1222_v32, %v1218_v49  ;;  %v1225_v56 = vmul.f32 %v1222_v32, %v1219_v29  ;;  %v1236_v32 = vpop.permute.xlu0 %1235 }
 0x255   : > { %2466 = vset.pattern.permute.xlu0 %v2547_v6 }
 0x256   : > { %v1226_v61 = vadd.f32 %v1224_v50, %v1210_v31  ;;  %v1227_v4 = vadd.f32 %v1225_v56, %v1211_v17  ;;  %2107 = vperm.xlu0 %2466, %v3033_v16   ;;  %v2304_v50 = vld [vmem:[%s3328_s4 + $0x20] sm:$0xff] }
 0x258   : > { %v3004_v33 = vmax.f32 %v1226_v61, 0.0  ;;  %v1231_v34 = vmax.f32 %v1227_v4, 0.0  ;;  %v1240_v6 = vpop.permute.xlu0 %1239 }
 0x259   : > { %v1245_v59 = vsel %vm265_vm0, %v1240_v6, %v1236_v32 }
 0x25a   : > { %1237 = vrot.lane.b32.xlu1 %v3004_v33, %s2537_s14  ;;  %2467 = vset.pattern.permute.xlu0 %v2549_v8  ;;  %v1247_v44 = vmul.f32 %v1245_v59, %v2721_v21  ;;  %v2332_v19 = vpack.c.bf16 %v1231_v34, %v2904_v53  ;;  %v2334_v60 = vpack.c.bf16 %v3004_v33, %v2897_v52 }
 0x25b   : > { %2123 = vperm.xlu0 %2467, %v3033_v16  }
 0x25e   : > { %1241 = vrot.lane.b32.xlu1 %v1231_v34, %s2537_s14 }
 0x25f   : > { %2468 = vset.pattern.permute.xlu0 %v2550_v9  ;;  %v1243_v9 = vsel %vm265_vm0, %v1236_v32, %v1240_v6 }
 0x260   : > { %2139 = vperm.xlu0 %2468, %v3033_v16   ;;  %v1248_v63 = vmul.f32 %v1243_v9, %v2718_v20 }
 0x262   : > { %1404 = vrot.lane.b32.xlu1 %v3004_v33, %s2538_s15 }
 0x264   : > { %2469 = vset.pattern.permute.xlu0 %v2551_v10 }
 0x265   : > { %2155 = vperm.xlu0 %2469, %v3033_v16  }
 0x266   : > { %1408 = vrot.lane.b32.xlu1 %v1231_v34, %s2538_s15 }
 0x269   : > { %2470 = vset.pattern.permute.xlu0 %v2552_v48 }
 0x26a   : > { %1498 = vrot.lane.b32.xlu1 %v3004_v33, %s2539_s16 }
 0x26e   : > { %1502 = vrot.lane.b32.xlu1 %v1231_v34, %s2539_s16 }
 0x272   : > { %1592 = vrot.lane.b32.xlu1 %v3004_v33, %s2540_s17 }
 0x276   : > { %1596 = vrot.lane.b32.xlu1 %v1231_v34, %s2540_s17 }
 0x27a   : > { %1686 = vrot.lane.b32.xlu1 %v3004_v33, %s2541_s18 }
 0x27e   : > { %1690 = vrot.lane.b32.xlu1 %v1231_v34, %s2541_s18 }
 0x282   : > { %1780 = vrot.lane.b32.xlu1 %v3004_v33, %s2542_s19 }
 0x286   : > { %1784 = vrot.lane.b32.xlu1 %v1231_v34, %s2542_s19 }
 0x28a   : > { %1874 = vrot.lane.b32.xlu1 %v3004_v33, %s2543_s20 }
 0x28e   : > { %1878 = vrot.lane.b32.xlu1 %v1231_v34, %s2543_s20 }
 0x292   : > { %1968 = vrot.lane.b32.xlu1 %v3004_v33, %s2544_s26 }
 0x296   : > { %1972 = vrot.lane.b32.xlu1 %v1231_v34, %s2544_s26 }
 0x29a   : > { %2075 = vperm.xlu1 %2464, %v3033_v16  }
 0x29e   : > { %2465 = vset.pattern.permute.xlu1 %v2548_v7  ;;  %v1403_v7 = vpop.permute.xlu0 %1402 }
 0x29f   : > { %2091 = vperm.xlu1 %2465, %v3033_v16  }
 0x2a2   : > { %v1407_v38 = vpop.permute.xlu0 %1406 }
 0x2a3   : > { %v1410_v22 = vsel %vm433_vm1, %v1403_v7, %v1407_v38  ;;  %v1412_v12 = vsel %vm433_vm1, %v1407_v38, %v1403_v7 }
 0x2a4   : > { %v1415_v1 = vmul.f32 %v1410_v22, %v2725_v24  ;;  %v1414_v30 = vmul.f32 %v1412_v12, %v2744_v35 }
 0x2a6   : > { %v1497_v39 = vpop.permute.xlu0 %1496 }
 0x2aa   : > { %v1501_v40 = vpop.permute.xlu0 %1500 }
 0x2ab   : > { %v1504_v31 = vsel %vm528_vm3, %v1497_v39, %v1501_v40  ;;  %v1506_v6 = vsel %vm528_vm3, %v1501_v40, %v1497_v39 }
 0x2ac   : > { %v1509_v33 = vmul.f32 %v1504_v31, %v2751_v37  ;;  %v1508_v59 = vmul.f32 %v1506_v6, %v2764_v45 }
 0x2ae   : > { %v3048_v8 = vpop.permute.xlu0 %1590 }
 0x2b2   : > { %v1595_v14 = vpop.permute.xlu0 %1594 }
 0x2b6   : > { %v1685_v53 = vpop.permute.xlu0 %1684 }
 0x2ba   : > { %v1689_v56 = vpop.permute.xlu0 %1688 }
 0x2bb   : > { %v1692_v12 = vsel %vm718_vm5, %v1685_v53, %v1689_v56 }
 0x2be   : > { %v1779_v9 = vpop.permute.xlu0 %1778 }
 0x2cc   : > { %v1238_v42 = vpop.permute.xlu1 %1237 }
 0x2d0   : > { %v1242_v43 = vpop.permute.xlu1 %1241 }
 0x2d1   : > { %v1244_v10 = vsel %vm265_vm0, %v1238_v42, %v1242_v43  ;;  %v1246_v48 = vsel %vm265_vm0, %v1242_v43, %v1238_v42  ;;  %v1598_v43 = vsel %vm623_vm4, %v3048_v8, %v1595_v14 }
 0x2d2   : > { %v1249_v46 = vmul.f32 %v1246_v48, %v2721_v21  ;;  %v1250_v54 = vmul.f32 %v1244_v10, %v2718_v20  ;;  %v2307_v10 = vld [vmem:[%s3328_s4 + $0x8] sm:$0xff]  ;;  %v1603_v40 = vmul.f32 %v1598_v43, %v2770_v47 }
 0x2d4   : > { %v1405_v58 = vpop.permute.xlu1 %1404  ;;  %v2328_v18 = vpack.c.bf16 %v1250_v54, %v1248_v63  ;;  %v2330_v62 = vpack.c.bf16 %v1249_v46, %v1247_v44  ;;  %v1600_v54 = vsel %vm623_vm4, %v1595_v14, %v3048_v8 }
 0x2d5   : > { %v1602_v22 = vmul.f32 %v1600_v54, %v2783_v55 }
 0x2d6   : > { %2329 = vmatprep.subr.bf16.mxu1 %v2328_v18 }
 0x2d7   : > { %2331 = vmatpush1.bf16.msra.mxu1 %v2330_v62 }
 0x2d8   : > { %v1409_v23 = vpop.permute.xlu1 %1408  ;;  %2333 = vmatprep.subr.bf16.mxu1 %v2332_v19 }
 0x2d9   : > { %v1411_v25 = vsel %vm433_vm1, %v1405_v58, %v1409_v23  ;;  %v1413_v27 = vsel %vm433_vm1, %v1409_v23, %v1405_v58  ;;  %v1783_v58 = vpop.permute.xlu0 %1782  ;;  %v2309_v23 = vld [vmem:[%s3328_s4 + $0x10] sm:$0xff] }
 0x2da   : > { %v1417_v5 = vmul.f32 %v1411_v25, %v2725_v24  ;;  %2305 = vmatmul.mubr.msk.f32.vlgmr.msra.gmra.mrb[0].mxu1 %vm1251_vm9, %v1234_v3  ;;  %v1416_v52 = vmul.f32 %v1413_v27, %v2744_v35  ;;  %v1694_v3 = vsel %vm718_vm5, %v1689_v56, %v1685_v53  ;;  %v1788_v31 = vsel %vm813_vm6, %v1783_v58, %v1779_v9 }
 0x2db   : > { %2335 = vmatpush1.bf16.msra.mxu1 %v2334_v60  ;;  %1393 = vmatprep.mubr.f32.mxu1 %v2536_v0  ;;  %v1697_v14 = vmul.f32 %v1694_v3, %v2789_v57  ;;  %v1791_v56 = vmul.f32 %v1788_v31, %v2808_v11  ;;  %v2315_v3 = vld [vmem:[%s3328_s4 + $0x30] sm:$0xff] }
 0x2dc   : > { %v1499_v49 = vpop.permute.xlu1 %1498  ;;  %v2336_v29 = vpack.c.bf16 %v1417_v5, %v1415_v1  ;;  %v2338_v61 = vpack.c.bf16 %v1416_v52, %v1414_v30  ;;  %v1696_v30 = vmul.f32 %v1692_v12, %v2802_v2 }
 0x2dd   : > { %v1873_v1 = vpop.permute.xlu0 %1872 }
 0x2de   : > { %2337 = vmatprep.subr.bf16.mxu1 %v2336_v29 }
 0x2e0   : > { %v1503_v17 = vpop.permute.xlu1 %1502 }
 0x2e1   : > { %v1505_v4 = vsel %vm528_vm3, %v1499_v49, %v1503_v17  ;;  %v1507_v34 = vsel %vm528_vm3, %v1503_v17, %v1499_v49  ;;  %v1877_v17 = vpop.permute.xlu0 %1876 }
 0x2e2   : > { %v1511_v32 = vmul.f32 %v1505_v4, %v2751_v37  ;;  %2306 = vmatmul.mubr.msk.f32.vlgmr.msra.gmra.mrb[0].mxu1 %vm1251_vm9, %v2304_v50  ;;  %v1510_v42 = vmul.f32 %v1507_v34, %v2764_v45  ;;  %v2311_v50 = vld [vmem:[%s3328_s4 + $0x18] sm:$0xff]  ;;  %v1882_v43 = vsel %vm908_vm7, %v1877_v17, %v1873_v1 }
 0x2e3   : > { %2339 = vmatpush1.bf16.msra.mxu1 %v2338_v61  ;;  %1485 = vmatprep.mubr.f32.mxu1 %v2536_v0 }
 0x2e4   : > { %v1593_v7 = vpop.permute.xlu1 %1592  ;;  %v2340_v38 = vpack.c.bf16 %v1511_v32, %v1509_v33  ;;  %v2342_v44 = vpack.c.bf16 %v1510_v42, %v1508_v59  ;;  %v1786_v32 = vsel %vm813_vm6, %v1779_v9, %v1783_v58 }
 0x2e5   : > { %v1967_v42 = vpop.permute.xlu0 %1966  ;;  %v1790_v59 = vmul.f32 %v1786_v32, %v2821_v26 }
 0x2e6   : > { %2341 = vmatprep.subr.bf16.mxu1 %v2340_v38 }
 0x2e8   : > { %v1597_v48 = vpop.permute.xlu1 %1596 }
 0x2e9   : > { %v1599_v39 = vsel %vm623_vm4, %v1593_v7, %v1597_v48  ;;  %v1601_v46 = vsel %vm623_vm4, %v1597_v48, %v1593_v7  ;;  %v1971_v54 = vpop.permute.xlu0 %1970 }
 0x2ea   : > { %v1605_v63 = vmul.f32 %v1599_v39, %v2770_v47  ;;  %2308 = vmatmul.mubr.msk.f32.vlgmr.msra.gmra.mrb[0].mxu1 %vm1251_vm9, %v2307_v10  ;;  %v1604_v19 = vmul.f32 %v1601_v46, %v2783_v55  ;;  %v2313_v10 = vld [vmem:[%s3328_s4 + $0x28] sm:$0xff]  ;;  %v1885_v39 = vmul.f32 %v1882_v43, %v2827_v28 }
 0x2eb   : > { %2343 = vmatpush1.bf16.msra.mxu1 %v2342_v44  ;;  %1579 = vmatprep.mubr.f32.mxu1 %v2536_v0 }
 0x2ec   : > { %v1687_v18 = vpop.permute.xlu1 %1686  ;;  %v2344_v62 = vpack.c.bf16 %v1605_v63, %v1603_v40  ;;  %v2346_v60 = vpack.c.bf16 %v1604_v19, %v1602_v22  ;;  %v1880_v63 = vsel %vm908_vm7, %v1873_v1, %v1877_v17  ;;  %v1976_v22 = vsel %vm1003_vm8, %v1971_v54, %v1967_v42 }
 0x2ed   : > { %v1884_v19 = vmul.f32 %v1880_v63, %v2839_v15 }
 0x2ee   : > { %2345 = vmatprep.subr.bf16.mxu1 %v2344_v62 }
 0x2f0   : > { %v1691_v25 = vpop.permute.xlu1 %1690 }
 0x2f1   : > { %v1695_v8 = vsel %vm718_vm5, %v1691_v25, %v1687_v18  ;;  %v1693_v27 = vsel %vm718_vm5, %v1687_v18, %v1691_v25 }
 0x2f2   : > { %v1699_v5 = vmul.f32 %v1695_v8, %v2789_v57  ;;  %2310 = vmatmul.mubr.msk.f32.vlgmr.msra.gmra.mrb[0].mxu1 %vm1251_vm9, %v2309_v23  ;;  %v1698_v52 = vmul.f32 %v1693_v27, %v2802_v2  ;;  %v1979_v8 = vmul.f32 %v2847_v36, %v1976_v22  ;;  %v1974_v27 = vsel %vm1003_vm8, %v1967_v42, %v1971_v54 }
 0x2f3   : > { %2347 = vmatpush1.bf16.msra.mxu1 %v2346_v60  ;;  %1673 = vmatprep.mubr.f32.mxu1 %v2536_v0 }
 0x2f4   : > { %v1781_v49 = vpop.permute.xlu1 %1780  ;;  %v2348_v29 = vpack.c.bf16 %v1699_v5, %v1697_v14  ;;  %v2350_v4 = vpack.c.bf16 %v1698_v52, %v1696_v30  ;;  %v2319_v30 = vld [vmem:[%s3328_s4 + $0x40] sm:$0xff] }
 0x2f6   : > { %2349 = vmatprep.subr.bf16.mxu1 %v2348_v29  ;;  %v2317_v29 = vld [vmem:[%s3328_s4 + $0x38] sm:$0xff] }
 0x2f8   : > { %v1785_v61 = vpop.permute.xlu1 %1784 }
 0x2f9   : > { %v1789_v53 = vsel %vm813_vm6, %v1785_v61, %v1781_v49  ;;  %v1787_v33 = vsel %vm813_vm6, %v1781_v49, %v1785_v61  ;;  %v1978_v49 = vmul.f32 %v2861_v41, %v1974_v27 }
 0x2fa   : > { %v1793_v34 = vmul.f32 %v1789_v53, %v2808_v11  ;;  %2312 = vmatmul.mubr.msk.f32.vlgmr.msra.gmra.mrb[0].mxu1 %vm1251_vm9, %v2311_v50  ;;  %v1792_v38 = vmul.f32 %v1787_v33, %v2821_v26 }
 0x2fb   : > { %2351 = vmatpush1.bf16.msra.mxu1 %v2350_v4  ;;  %1767 = vmatprep.mubr.f32.mxu1 %v2536_v0  ;;  %v2062_v4 = vpop.permute.xlu0 %2061 }
 0x2fc   : > { %v1875_v6 = vpop.permute.xlu1 %1874  ;;  %v2352_v7 = vpack.c.bf16 %v1793_v34, %v1791_v56  ;;  %v2354_v44 = vpack.c.bf16 %v1792_v38, %v1790_v59 }
 0x2fe   : > { %2353 = vmatprep.subr.bf16.mxu1 %v2352_v7 }
 0x2ff   : > { %v2108_v56 = vpop.permute.xlu0 %2107 }
 0x300   : > { %v1879_v48 = vpop.permute.xlu1 %1878 }
 0x301   : > { %v1883_v9 = vsel %vm908_vm7, %v1879_v48, %v1875_v6  ;;  %v1881_v40 = vsel %vm908_vm7, %v1875_v6, %v1879_v48 }
 0x302   : > { %v1887_v46 = vmul.f32 %v1883_v9, %v2827_v28  ;;  %2314 = vmatmul.mubr.msk.f32.vlgmr.msra.gmra.mrb[0].mxu1 %vm1251_vm9, %v2313_v10  ;;  %v1886_v62 = vmul.f32 %v1881_v40, %v2839_v15 }
 0x303   : > { %2355 = vmatpush1.bf16.msra.mxu1 %v2354_v44  ;;  %1861 = vmatprep.mubr.f32.mxu1 %v2536_v0  ;;  %v2124_v34 = vpop.permute.xlu0 %2123 }
 0x304   : > { %v1969_v58 = vpop.permute.xlu1 %1968  ;;  %v2356_v18 = vpack.c.bf16 %v1887_v46, %v1885_v39  ;;  %v2358_v25 = vpack.c.bf16 %v1886_v62, %v1884_v19 }
 0x306   : > { %2357 = vmatprep.subr.bf16.mxu1 %v2356_v18 }
 0x307   : > { %v2140_v7 = vpop.permute.xlu0 %2139 }
 0x308   : > { %v1973_v23 = vpop.permute.xlu1 %1972 }
 0x309   : > { %v1977_v60 = vsel %vm1003_vm8, %v1973_v23, %v1969_v58  ;;  %v1975_v14 = vsel %vm1003_vm8, %v1969_v58, %v1973_v23 }
 0x30a   : > { %v1981_v1 = vmul.f32 %v2847_v36, %v1977_v60  ;;  %2316 = vmatmul.mubr.msk.f32.vlgmr.msra.gmra.mrb[0].mxu1 %vm1251_vm9, %v2315_v3  ;;  %v1980_v12 = vmul.f32 %v2861_v41, %v1975_v14 }
 0x30b   : > { %2359 = vmatpush1.bf16.msra.mxu1 %v2358_v25  ;;  %1955 = vmatprep.mubr.f32.mxu1 %v2536_v0  ;;  %v2156_v42 = vpop.permute.xlu0 %2155 }
 0x30c   : > { %v2360_v5 = vpack.c.bf16 %v1981_v1, %v1979_v8  ;;  %v2362_v52 = vpack.c.bf16 %v1980_v12, %v1978_v49 }
 0x30e   : > { %2361 = vmatprep.subr.bf16.mxu1 %v2360_v5 }
 0x312   : > { %2318 = vmatmul.mubr.msk.f32.vlgmr.msra.gmra.mrb[0].mxu1 %vm1251_vm9, %v2317_v29 }
 0x313   : > { %2363 = vmatpush1.bf16.msra.mxu1 %v2362_v52  ;;  %2049 = vmatprep.mubr.f32.mxu1 %v2536_v0 }
 0x319   : > { %v2076_v0 = vpop.permute.xlu1 %2075 }
 0x31a   : > { %2320 = vmatmul.mubr.msk.f32.vlgmr.msra.gmra.mrb[0].mxu1 %vm1251_vm9, %v2319_v30 }
 0x3ed   : > { %v2051_v31 = vpop.f32.mrb[0].mxu1 }
 0x3ee   : > { %2082 = vrot.lane.b32.xlu1 %v2051_v31, %s2538_s15  ;;  %2066 = vrot.lane.b32.xlu0 %v2051_v31, %s2537_s14  ;;  %v2053_v50 = vpop.f32.mrb[1].mxu1  ;;  %v2194_v17 = vmax.f32 %v2051_v31, 0.0 }
 0x3ef   : > { %v2195_v61 = vmax.f32 %v2053_v50, 0.0  ;;  %v2065_v60 = vmul.f32 %v2062_v4, %v2053_v50 }
 0x3f0   : > { %2198 = vst [vmem:[%s3200_s29] sm:$0xff] %v2194_v17 }
 0x3f1   : > { %2199 = vst [vmem:[%s3200_s29 + $0x8] sm:$0xff] %v2195_v61 }
 0x3f2   : > { %2098 = vrot.lane.b32.xlu1 %v2051_v31, %s2539_s16  ;;  %2171 = vperm.xlu0 %2470, %v3033_v16  }
 0x3f6   : > { %2114 = vrot.lane.b32.xlu1 %v2051_v31, %s2540_s17  ;;  %2471 = vset.pattern.permute.xlu0 %v2553_v51  ;;  %v2092_v51 = vpop.permute.xlu1 %2091 }
 0x3f7   : > { %2187 = vperm.xlu0 %2471, %v3033_v16  }
 0x3fa   : > { %2130 = vrot.lane.b32.xlu1 %v2051_v31, %s2541_s18 }
 0x3fb   : > { %2178 = vrot.lane.b32.xlu0 %v2051_v31, %s2544_s26 }
 0x3fe   : > { %2146 = vrot.lane.b32.xlu1 %v2051_v31, %s2542_s19 }
 0x402   : > { %2162 = vrot.lane.b32.xlu1 %v2051_v31, %s2543_s20 }
 0x406   : > { %2068 = vrot.lane.b32.xlu1 %v2053_v50, %s2537_s14  ;;  %s2327_s14 = sshll.u32 %s2612_s25, 9 }
 0x40a   : > { %2084 = vrot.lane.b32.xlu1 %v2053_v50, %s2538_s15 }
 0x40e   : > { %2100 = vrot.lane.b32.xlu1 %v2053_v50, %s2539_s16  ;;  %s2216_s16 = sshll.u32 %s3200_s29, 4  ;;  %s3276_s16 = int_to_ptr.vmem [resolvable:$true] %s2216_s16 }
 0x40f   : > { %s2472_s25 = scalar_lea.vmem %s3276_s16, 512 }
 0x410   : > { %p2473_p11 = scmp.ne.s32.totalorder %s3276_s16, %s2472_s25 }
 0x412   : > { %2116 = vrot.lane.b32.xlu1 %v2053_v50, %s2540_s17  ;;  %p2474_p12 = pnand %p2473_p11, %p2629_p5 }
 0x414   : > { %p2475_p13 = pneg %p2474_p12 }
 0x416   : > { %2132 = vrot.lane.b32.xlu1 %v2053_v50, %s2541_s18 }
 0x41a   : > { %2148 = vrot.lane.b32.xlu1 %v2053_v50, %s2542_s19  ;;  %s3274_s19 = scalar_lea.hbm %s3330_s6, %s2327_s14 }
 0x41e   : > { %2164 = vrot.lane.b32.xlu1 %v2053_v50, %s2543_s20  ;;  %s3282_s20 = scalar_lea.sflag [#allocation3], %s242_s13 }
 0x422   : > { %2180 = vrot.lane.b32.xlu1 %v2053_v50, %s2544_s26  ;;  %s2554_s26 = smov [#allocation2]  }
 0x423   : > { %s2476_s9 = sshll.u32 %s2554_s26, 4  ;;  %s2477_s9 = int_to_ptr.vmem [resolvable:$false] %s2476_s9 }
 0x424   : > { %s2478_s10 = scalar_lea.vmem %s2477_s9, 1024  ;;  %p2479_p0 = scmp.lt.s32.totalorder %s3276_s16, %s2477_s9 }
 0x425   : > { %p2480_p1 = scmp.lt.s32.totalorder %s2478_s10, %s2472_s25 }
 0x427   : > { %p2481_p2 = por %p2480_p1, %p2479_p0 }
 0x429   : > { %p2482_p3 = pnand %p2481_p2, %p2475_p13 }
 0x460   : > { %v2083_v16 = vpop.permute.xlu1 %2082  ;;  %v2067_v10 = vpop.permute.xlu0 %2066 }
 0x464   : > { %v2099_v53 = vpop.permute.xlu1 %2098 }
 0x468   : > { %v2115_v33 = vpop.permute.xlu1 %2114 }
 0x46c   : > { %v2131_v32 = vpop.permute.xlu1 %2130 }
 0x470   : > { %v2147_v6 = vpop.permute.xlu1 %2146 }
 0x471   : > { %v2172_v25 = vpop.permute.xlu0 %2171 }
 0x474   : > { %v2163_v38 = vpop.permute.xlu1 %2162 }
 0x478   : > { %v2069_v59 = vpop.permute.xlu1 %2068 }
 0x479   : > { %v2070_v48 = vsel %vm265_vm0, %v2067_v10, %v2069_v59  ;;  %v2071_v44 = vsel %vm265_vm0, %v2069_v59, %v2067_v10 }
 0x47a   : > { %v2072_v46 = vmul.f32 %v2071_v44, %v2721_v21  ;;  %v2073_v63 = vmul.f32 %v2070_v48, %v2718_v20 }
 0x47c   : > { %v2085_v43 = vpop.permute.xlu1 %2084  ;;  %v2078_v22 = vmul.f32 %v2076_v0, %v2072_v46  ;;  %v2079_v3 = vmul.f32 %v2076_v0, %v2073_v63 }
 0x47d   : > { %v2086_v39 = vsel %vm433_vm1, %v2083_v16, %v2085_v43  ;;  %v2087_v40 = vsel %vm433_vm1, %v2085_v43, %v2083_v16  ;;  %v2188_v16 = vpop.permute.xlu0 %2187 }
 0x47e   : > { %v2088_v54 = vmul.f32 %v2087_v40, %v2744_v35  ;;  %v2089_v58 = vmul.f32 %v2086_v39, %v2725_v24  ;;  %v2064_v24 = vmul.f32 %v2062_v4, %v2051_v31 }
 0x480   : > { %v2101_v9 = vpop.permute.xlu1 %2100  ;;  %v2094_v8 = vmul.f32 %v2092_v51, %v2088_v54  ;;  %v2095_v14 = vmul.f32 %v2092_v51, %v2089_v58  ;;  %v2080_v29 = vadd.f32 %v2078_v22, %v2064_v24 }
 0x481   : > { %v2102_v18 = vsel %vm528_vm3, %v2099_v53, %v2101_v9  ;;  %v2103_v62 = vsel %vm528_vm3, %v2101_v9, %v2099_v53 }
 0x482   : > { %v2104_v20 = vmul.f32 %v2103_v62, %v2764_v45  ;;  %v2105_v35 = vmul.f32 %v2102_v18, %v2751_v37  ;;  %v2081_v45 = vadd.f32 %v2079_v3, %v2065_v60  ;;  %v2096_v30 = vadd.f32 %v2094_v8, %v2080_v29 }
 0x484   : > { %v2117_v19 = vpop.permute.xlu1 %2116  ;;  %v2110_v52 = vmul.f32 %v2108_v56, %v2104_v20  ;;  %v2111_v37 = vmul.f32 %v2108_v56, %v2105_v35  ;;  %v2097_v31 = vadd.f32 %v2095_v14, %v2081_v45 }
 0x485   : > { %v2118_v23 = vsel %vm623_vm4, %v2115_v33, %v2117_v19  ;;  %v2119_v21 = vsel %vm623_vm4, %v2117_v19, %v2115_v33 }
 0x486   : > { %v2120_v27 = vmul.f32 %v2119_v21, %v2783_v55  ;;  %v2121_v5 = vmul.f32 %v2118_v23, %v2770_v47  ;;  %v2112_v56 = vadd.f32 %v2110_v52, %v2096_v30  ;;  %v2113_v33 = vadd.f32 %v2111_v37, %v2097_v31 }
 0x488   : > { %v2133_v1 = vpop.permute.xlu1 %2132  ;;  %v2126_v55 = vmul.f32 %v2124_v34, %v2120_v27  ;;  %v2127_v0 = vmul.f32 %v2124_v34, %v2121_v5 }
 0x489   : > { %v2134_v12 = vsel %vm718_vm5, %v2131_v32, %v2133_v1  ;;  %v2135_v49 = vsel %vm718_vm5, %v2133_v1, %v2131_v32 }
 0x48a   : > { %v2136_v50 = vmul.f32 %v2134_v12, %v2802_v2  ;;  %v2137_v17 = vmul.f32 %v2135_v49, %v2789_v57  ;;  %v2128_v57 = vadd.f32 %v2126_v55, %v2112_v56  ;;  %v2129_v43 = vadd.f32 %v2127_v0, %v2113_v33 }
 0x48c   : > { %v2149_v61 = vpop.permute.xlu1 %2148  ;;  %v2142_v32 = vmul.f32 %v2140_v7, %v2136_v50  ;;  %v2143_v2 = vmul.f32 %v2140_v7, %v2137_v17 }
 0x48d   : > { %v2150_v47 = vsel %vm813_vm6, %v2147_v6, %v2149_v61  ;;  %v2151_v51 = vsel %vm813_vm6, %v2149_v61, %v2147_v6 }
 0x48e   : > { %v2152_v4 = vmul.f32 %v2150_v47, %v2821_v26  ;;  %v2153_v53 = vmul.f32 %v2151_v51, %v2808_v11  ;;  %v2179_v11 = vpop.permute.xlu0 %2178  ;;  %v2144_v9 = vadd.f32 %v2142_v32, %v2128_v57  ;;  %v2145_v7 = vadd.f32 %v2143_v2, %v2129_v43 }
 0x490   : > { %v2165_v59 = vpop.permute.xlu1 %2164  ;;  %v2158_v48 = vmul.f32 %v2156_v42, %v2152_v4  ;;  %v2159_v6 = vmul.f32 %v2156_v42, %v2153_v53 }
 0x491   : > { %v2166_v34 = vsel %vm908_vm7, %v2163_v38, %v2165_v59  ;;  %v2167_v10 = vsel %vm908_vm7, %v2165_v59, %v2163_v38 }
 0x492   : > { %v2168_v44 = vmul.f32 %v2166_v34, %v2839_v15  ;;  %v2169_v26 = vmul.f32 %v2167_v10, %v2827_v28  ;;  %v2160_v54 = vadd.f32 %v2158_v48, %v2144_v9  ;;  %v2161_v42 = vadd.f32 %v2159_v6, %v2145_v7 }
 0x494   : > { %v2174_v39 = vmul.f32 %v2172_v25, %v2168_v44  ;;  %v2175_v40 = vmul.f32 %v2172_v25, %v2169_v26  ;;  %v2181_v46 = vpop.permute.xlu1 %2180 }
 0x495   : > { %v2182_v63 = vsel %vm1003_vm8, %v2179_v11, %v2181_v46  ;;  %v2183_v38 = vsel %vm1003_vm8, %v2181_v46, %v2179_v11 }
 0x496   : > { %v2184_v28 = vmul.f32 %v2861_v41, %v2182_v63  ;;  %v2185_v15 = vmul.f32 %v2847_v36, %v2183_v38  ;;  %v2176_v58 = vadd.f32 %v2174_v39, %v2160_v54  ;;  %v2177_v18 = vadd.f32 %v2175_v40, %v2161_v42 }
 0x498   : > { %v2190_v62 = vmul.f32 %v2188_v16, %v2184_v28  ;;  %v2191_v19 = vmul.f32 %v2188_v16, %v2185_v15 }
 0x49a   : > { %v2192_v22 = vadd.f32 %v2190_v62, %v2176_v58  ;;  %v2193_v3 = vadd.f32 %v2191_v19, %v2177_v18 }
 0x49c   : > { %v2196_v13 = vmax.f32 %v2192_v22, 0.0  ;;  %v2197_v23 = vmax.f32 %v2193_v3, 0.0 }
 0x49e   : > { %2200 = vst [vmem:[%s3200_s29 + $0x10] sm:$0xff] %v2196_v13  ;;  %2201 = vst [vmem:[%s3200_s29 + $0x18] sm:$0xff] %v2197_v23 }
 0x49f   : > { %2485 = shalt.err (!%p2482_p3)
}
 0x4a0   : > { %s2486_s11 = scalar_lea.hbm %s3274_s19, 512  ;;  %s2490_s28 = scalar_lea.hbm %s3330_s6, 1024 }
 0x4a1   : > { %p2487_p4 = scmp.ne.s32.totalorder %s3274_s19, %s2486_s11  ;;  %p2491_p9 = scmp.lt.u32.totalorder %s3274_s19, %s3330_s6 }
 0x4a2   : > { %p2492_p10 = scmp.lt.u32.totalorder %s2490_s28, %s2486_s11  ;;  %p2494_p12 = scmp.lt.u32.totalorder %s2486_s11, %s3274_s19 }
 0x4a3   : > { %p2488_p7 = pnand %p2487_p4, %p2629_p5 }
 0x4a4   : > { %p2493_p11 = por %p2492_p10, %p2491_p9 }
 0x4a5   : > { %p2489_p8 = pneg %p2488_p7 }
 0x4a6   : > { %p2495_p13 = por %p2494_p12, %p2493_p11 }
 0x4a8   : > { %p2496_p0 = pnand %p2495_p13, %p2489_p8 }
 0x4aa   : > { %2499 = shalt.err (!%p2496_p0)
}
 0x4ab   : > { %s2555_s17 = smov 256  }
 0x4ac   : > { %2396 = dma.vmem_to_hbm [thread:$0]  (%p2629_p5), %s3276_s16, 512, %s3274_s19, %s3282_s20, %s2555_s17, %s2555_s17, %s2538_s15  }
 0x4ad PF: > { %p2402_p1 = scmp.ge.s32.totalorder %s2534_s24, 2  ;;  %s2231_s18 = sand.u32 1, %s2522_s21  }
 0x4ae   : > { %s2232_s25 = scalar_lea.sflag [#allocation3], %s2231_s18 }
 0x4af   : > { %p2399_p2 = pnand %p2402_p1, %p2633_p6 }
 0x4b1   : > { %2517 = dma.done.wait (!%p2399_p2), %s2232_s25, 512  }
 0x4b2   : > { %2519 = vsyncadd (!%p2399_p2), %s2232_s25, 4294966784  ;;  %p16_p3 = scmp.ge.s32.totalorder %s2616_s27, 4   ;;  %s3333_s21 = smov %s2526_s22 }
 0x4b3   : > { %s3334_s22 = smov %s2530_s23  ;;  %s3335_s23 = smov %s2627_s30 }
 0x4b4   : > { %s3336_s24 = smov %s2616_s27  ;;  %18 = sbr.rel (!%p16_p3) target bundleno = 3 (0x3), region = 95 }
 0x4bb   :  { %2237 = vsyncpa [#allocation3], 1 }
 0x4bc   :  { %2239 = vsyncpa [#allocation3 + $0x1], 1 }

</bundles_post_ra>
